<compile_context>
chip_gen: v5e
topology: v5e:2x2
jax: 0.10.0
libtpu: 0.0.40
codegen_flags: <defaults>
</compile_context>

<pallas_src>
import functools

import numpy as np
import jax
import jax.numpy as jnp
from jax.experimental import pallas as pl
from jax.experimental.pallas import tpu as pltpu

EPS = 1e-5
LRELU_SLOPE = 0.2
_WROW_ALIGN = 16          # bf16 sublane tile height -> aligned weight-slab rows
_AROW_ALIGN = 8           # f32 sublane tile height


# ---------------------------------------------------------------------------
# Structural constants (numpy, shape-only)
# ---------------------------------------------------------------------------

def _interp_diff_matrix(n):
    """(n, n) matrix m with m @ p == bilinear-resize(p[1:] - p[:-1]).

    Reproduces torch F.interpolate(..., mode='bilinear', align_corners=False)
    along the frame axis (joint-axis resize is identity), composed with the
    frame difference.
    """
    m_in = n - 1
    A = np.zeros((n, m_in), np.float64)
    scale = m_in / n
    for i in range(n):
        src = max((i + 0.5) * scale - 0.5, 0.0)
        h1 = min(int(np.floor(src)), m_in - 1)
        lam = src - h1
        h1p = 1 if h1 < m_in - 1 else 0
        A[i, h1] += 1.0 - lam
        A[i, h1 + h1p] += lam
    Bm = np.zeros((n, n), np.float64)
    Bm[:, 1:] += A
    Bm[:, :-1] -= A
    return Bm.astype(np.float32)


def _block_diag(m, B):
    r, c = m.shape
    out = np.zeros((B * r, B * c), np.float32)
    for b in range(B):
        out[b * r:(b + 1) * r, b * c:(b + 1) * c] = m
    return out


def _select_rows(L, idxs):
    S = np.zeros((len(idxs), L), np.float32)
    for r, i in enumerate(idxs):
        S[r, i] = 1.0
    return S


# ---------------------------------------------------------------------------
# Host-side packing: all params / constants -> 3 slabs + static offset meta
# ---------------------------------------------------------------------------

def _pack_model(params, B, L, feat_d, jd, filters, class_num):
    L2, L4, L8 = L // 2, L // 4, L // 8
    bn_scale = 1.0 / np.sqrt(1.0 + EPS)       # eval BN: mean=0, var=1
    WCOLS = max(128, B * L)                   # matmul operand slab width
    ACOLS = max(8 * filters, 8)               # per-frame affine / mask slab width

    w_blocks, a_blocks = [], []
    w_rows, a_rows = 0, 0
    flops = 0

    def _add(blocks, rows_so_far, mat, width, align):
        mat = np.asarray(mat, np.float32)
        r, c = mat.shape
        rp = -(-r // align) * align
        blk = np.zeros((rp, width), np.float32)
        blk[:r, :c] = mat
        blocks.append(blk)
        return rows_so_far, rows_so_far + rp

    def add_w(mat):
        nonlocal w_rows
        off, w_rows = _add(w_blocks, w_rows, mat, WCOLS, _WROW_ALIGN)
        return off

    def add_a(mat):
        nonlocal a_rows
        off, a_rows = _add(a_blocks, a_rows, mat, ACOLS, _AROW_ALIGN)
        return off

    conv_meta = {}

    def add_conv(name, Lc, cin_groups, cout, k):
        nonlocal flops
        w = np.asarray(params[name]["w"], np.float32)        # (cout, cin_tot, k)
        rows = B * Lc
        groups, c0 = [], 0
        for cin in cin_groups:
            taps = tuple(add_w(w[:, c0:c0 + cin, kk].T) for kk in range(k))
            groups.append((taps, cin))
            c0 += cin
            flops += 2 * rows * cin * cout * k
        gamma = np.asarray(params[name]["gamma"], np.float32) * bn_scale   # (Lc,)
        beta = np.asarray(params[name]["beta"], np.float32)
        scale_off = add_a(np.tile(gamma.reshape(Lc, 1), (B, ACOLS)))
        shift_off = add_a(np.tile(beta.reshape(Lc, 1), (B, ACOLS)))
        conv_meta[name] = dict(Lc=Lc, rows=rows, K=k, cout=cout,
                               groups=tuple(groups),
                               scale=scale_off, shift=shift_off)

    f = filters
    add_conv("jcd1", L, [feat_d], 2 * f, 1)
    add_conv("jcd2", L, [2 * f], f, 3)
    add_conv("jcd3", L, [f], f, 1)
    add_conv("slow1", L, [jd], 2 * f, 1)
    add_conv("slow2", L, [2 * f], f, 3)
    add_conv("slow3", L, [f], f, 1)
    add_conv("fast1", L2, [jd], 2 * f, 1)
    add_conv("fast2", L2, [2 * f], f, 3)
    add_conv("fast3", L2, [f], f, 1)
    # torch.cat((x, x_slow, x_fast), dim=2) folded into b1a's split weights
    add_conv("b1a", L2, [f, f, f], 2 * f, 3)
    add_conv("b1b", L2, [2 * f], 2 * f, 3)
    add_conv("b2a", L4, [2 * f], 4 * f, 3)
    add_conv("b2b", L4, [4 * f], 4 * f, 3)
    add_conv("b3a", L8, [4 * f], 8 * f, 3)
    add_conv("b3b", L8, [8 * f], 8 * f, 3)

    # 0/1 masks zeroing the rows that wrap across batch boundaries after a roll
    mask_meta = {}
    for Lc in (L, L2, L4, L8):
        rows = B * Lc
        r = np.arange(rows)
        first = (r % Lc != 0).astype(np.float32).reshape(rows, 1)
        last = (r % Lc != Lc - 1).astype(np.float32).reshape(rows, 1)
        mask_meta[Lc] = (add_a(np.tile(first, (1, ACOLS))),
                         add_a(np.tile(last, (1, ACOLS))))

    # poses_motion structure: frame-diff + bilinear resize (+ stride-2 frames)
    d_slow = _block_diag(_interp_diff_matrix(L), B)                       # (BL, BL)
    d_fast = _block_diag(
        _interp_diff_matrix(L2) @ _select_rows(L, list(range(0, L, 2))), B)
    dslow_off = add_w(d_slow)
    dfast_off = add_w(d_fast)
    flops += 2 * (B * L) * (B * L) * jd + 2 * (B * L2) * (B * L) * jd

    # dense head: weights into the weight slab, bias / BN affine as rows
    rowv_np = np.zeros((8, 128), np.float32)
    dense_meta = {}
    nrow = 0

    def add_dense(name, din, dout, bn=True):
        nonlocal nrow, flops
        ent = dict(w=add_w(np.asarray(params[name]["w"], np.float32).T),
                   din=din, dout=dout)
        rowv_np[nrow, :dout] = np.asarray(params[name]["b"], np.float32)
        ent["b"] = nrow
        nrow += 1
        if bn:
            rowv_np[nrow, :dout] = (np.asarray(params[name]["gamma"], np.float32)
                                    * bn_scale)
            ent["s"] = nrow
            nrow += 1
            rowv_np[nrow, :dout] = np.asarray(params[name]["beta"], np.float32)
            ent["t"] = nrow
            nrow += 1
        dense_meta[name] = ent
        flops += 2 * B * din * dout

    add_dense("lin1", 8 * f, 128)
    add_dense("lin2", 128, 128)
    add_dense("lin3", 128, class_num, bn=False)

    wts = jnp.asarray(np.concatenate(w_blocks, axis=0), jnp.bfloat16)
    affv = jnp.asarray(np.concatenate(a_blocks, axis=0), jnp.float32)
    rowv = jnp.asarray(rowv_np, jnp.float32)

    meta = dict(B=B, L=L, feat_d=feat_d, jd=jd, filters=filters,
                class_num=class_num, acols=ACOLS,
                conv=conv_meta, dense=dense_meta, masks=mask_meta,
                dslow=dslow_off, dfast=dfast_off, flops=int(flops))
    return wts, affv, rowv, meta


# ---------------------------------------------------------------------------
# The single fused Pallas kernel
# ---------------------------------------------------------------------------

def _ddnet_kernel(m_ref, p_ref, w_ref, a_ref, r_ref, out_ref, scr_ref, *, meta):
    B, L = meta["B"], meta["L"]
    L2, L8 = L // 2, L // 8

    def wmat(off, r, c):                       # bf16 matmul operand
        return w_ref[off:off + r, 0:c]

    def amat(off, r, c):                       # f32 per-frame affine / mask
        return a_ref[off:off + r, 0:c]

    def lrelu(y):
        return jnp.maximum(y, LRELU_SLOPE * y)

    def dot(a_bf16, b_bf16):
        return jnp.dot(a_bf16, b_bf16, preferred_element_type=jnp.float32)

    def conv(xs, name):
        """c1D: Conv1d('same', no bias) + eval-BN(frames) + leaky_relu(0.2)."""
        lm = meta["conv"][name]
        Lc, rows, K, cout = lm["Lc"], lm["rows"], lm["K"], lm["cout"]
        acc = None
        for x, (taps, cin) in zip(xs, lm["groups"]):
            xb = x.astype(jnp.bfloat16)
            t_mid = dot(xb, wmat(taps[K // 2], cin, cout))          # centre tap
            acc = t_mid if acc is None else acc + t_mid
            if K == 3:
                mf_off, ml_off = meta["masks"][Lc]
                t_prev = dot(xb, wmat(taps[0], cin, cout))
                t_next = dot(xb, wmat(taps[2], cin, cout))
                # Shift the *products* by one row (off-MXU: slice + concat) and
                # zero the rows that wrapped across a batch/sequence boundary.
                # (pltpu.roll would be an equivalent single-XLU-op alternative.)
                acc = acc + amat(mf_off, rows, cout) * jnp.roll(t_prev, 1, axis=0)
                acc = acc + amat(ml_off, rows, cout) * jnp.roll(t_next, -1, axis=0)
        y = acc * amat(lm["scale"], rows, cout) + amat(lm["shift"], rows, cout)
        return lrelu(y)

    def pool2(x):
        """MaxPool1d(kernel_size=2) along frames via strided VMEM row reads."""
        rows, cols = x.shape
        half = rows // 2
        scr_ref[0:rows, 0:cols] = x
        ev = scr_ref[pl.ds(0, half, 2)]
        od = scr_ref[pl.ds(1, half, 2)]
        return jnp.maximum(ev, od)[:, 0:cols]

    def temporal_max(y):
        """torch.max(x, dim=1).values over the final L//8 frames, per batch."""
        rows, cols = y.shape                   # rows = B * L8
        scr_ref[0:rows, 0:cols] = y
        feat = scr_ref[pl.ds(0, B, L8)]
        for t in range(1, L8):
            feat = jnp.maximum(feat, scr_ref[pl.ds(t, B, L8)])
        return feat[:, 0:cols]                 # (B, 8f)

    def dense(x, name, act=True):              # d1D (plain Linear if act=False)
        dm = meta["dense"][name]
        dout = dm["dout"]
        y = dot(x.astype(jnp.bfloat16), wmat(dm["w"], dm["din"], dout))
        y = y + r_ref[dm["b"]:dm["b"] + 1, 0:dout]
        if act:
            y = y * r_ref[dm["s"]:dm["s"] + 1, 0:dout] \
                + r_ref[dm["t"]:dm["t"] + 1, 0:dout]
            y = lrelu(y)
        return y

    scr_ref[...] = jnp.zeros(scr_ref.shape, scr_ref.dtype)   # hygiene

    Mv = m_ref[...]                                          # (B*L, feat_d) f32
    Pv = p_ref[...].astype(jnp.bfloat16)                     # (B*L, J*D)

    # poses_motion: frame diff + bilinear resize (fast branch: stride-2 frames)
    diff_slow = dot(wmat(meta["dslow"], B * L, B * L), Pv)   # (B*L,  J*D)
    diff_fast = dot(wmat(meta["dfast"], B * L2, B * L), Pv)  # (B*L2, J*D)

    # JCD branch
    x = conv([Mv], "jcd1")
    x = conv([x], "jcd2")
    x = conv([x], "jcd3")
    x = pool2(x)                                             # (B*L2, f)

    # slow pose-motion branch
    xs = conv([diff_slow], "slow1")
    xs = conv([xs], "slow2")
    xs = conv([xs], "slow3")
    xs = pool2(xs)                                           # (B*L2, f)

    # fast pose-motion branch
    xf = conv([diff_fast], "fast1")
    xf = conv([xf], "fast2")
    xf = conv([xf], "fast3")                                 # (B*L2, f)

    # concat folded into b1a's split weight groups
    y = conv([x, xs, xf], "b1a")
    y = conv([y], "b1b")
    y = pool2(y)                                             # (B*L4, 2f)
    y = conv([y], "b2a")
    y = conv([y], "b2b")
    y = pool2(y)                                             # (B*L8, 4f)
    y = conv([y], "b3a")
    y = conv([y], "b3b")                                     # (B*L8, 8f)

    feat = temporal_max(y)                                   # (B, 8f)
    h = dense(feat, "lin1")
    h = dense(h, "lin2")
    out_ref[...] = dense(h, "lin3", act=False)


# ---------------------------------------------------------------------------
# Forward builder: one pallas_call, everything resident in VMEM
# ---------------------------------------------------------------------------

def build_ddnet_forward(params, B, frame_l, joint_n, joint_d, feat_d, filters,
                        class_num):
    L = frame_l
    assert L % 8 == 0, "frame_l must be divisible by 8"
    jd = joint_n * joint_d

    wts, affv, rowv, meta = _pack_model(params, B, L, feat_d, jd, filters,
                                        class_num)
    bytes_accessed = int(wts.size * 2 + affv.size * 4 + rowv.size * 4
                         + B * L * (feat_d + jd) * 4 + B * class_num * 4)

    kernel = pl.pallas_call(
        functools.partial(_ddnet_kernel, meta=meta),
        out_shape=jax.ShapeDtypeStruct((B, class_num), jnp.float32),
        in_specs=[pl.BlockSpec(memory_space=pltpu.MemorySpace.VMEM)] * 5,
        out_specs=pl.BlockSpec(memory_space=pltpu.MemorySpace.VMEM),
        scratch_shapes=[pltpu.VMEM((B * L, meta["acols"]), jnp.float32)],
        compiler_params=pltpu.CompilerParams(
            vmem_limit_bytes=32 * 1024 * 1024),
        cost_estimate=pl.CostEstimate(flops=meta["flops"], transcendentals=0,
                                      bytes_accessed=bytes_accessed),
    )

    @jax.jit
    def forward(M, P):
        M2 = M.reshape(B * L, feat_d).astype(jnp.float32)
        P2 = P.reshape(B * L, jd).astype(jnp.float32)
        return kernel(M2, P2, wts, affv, rowv)

    return forward


# ---------------------------------------------------------------------------
# Deterministic parameter initialization (synthetic weights)
# ---------------------------------------------------------------------------

def _conv_params(key, L, cin, cout, k):
    kw, kg, kb = jax.random.split(key, 3)
    w = jax.random.normal(kw, (cout, cin, k), jnp.float32) / np.sqrt(cin * k)
    gamma = 1.0 + 0.1 * jax.random.normal(kg, (L,), jnp.float32)
    beta = 0.1 * jax.random.normal(kb, (L,), jnp.float32)
    return {"w": w, "gamma": gamma, "beta": beta}


def _dense_params(key, din, dout):
    kw, kb, kg, kbb = jax.random.split(key, 4)
    w = jax.random.normal(kw, (dout, din), jnp.float32) / np.sqrt(din)
    b = 0.1 * jax.random.normal(kb, (dout,), jnp.float32)
    gamma = 1.0 + 0.1 * jax.random.normal(kg, (dout,), jnp.float32)
    beta = 0.1 * jax.random.normal(kbb, (dout,), jnp.float32)
    return {"w": w, "b": b, "gamma": gamma, "beta": beta}


def init_ddnet_params(key, frame_l, joint_n, joint_d, feat_d, filters,
                      class_num):
    ks = jax.random.split(key, 18)
    jd = joint_n * joint_d
    p = {}
    p["jcd1"] = _conv_params(ks[0], frame_l, feat_d, 2 * filters, 1)
    p["jcd2"] = _conv_params(ks[1], frame_l, 2 * filters, filters, 3)
    p["jcd3"] = _conv_params(ks[2], frame_l, filters, filters, 1)
    p["slow1"] = _conv_params(ks[3], frame_l, jd, 2 * filters, 1)
    p["slow2"] = _conv_params(ks[4], frame_l, 2 * filters, filters, 3)
    p["slow3"] = _conv_params(ks[5], frame_l, filters, filters, 1)
    p["fast1"] = _conv_params(ks[6], frame_l // 2, jd, 2 * filters, 1)
    p["fast2"] = _conv_params(ks[7], frame_l // 2, 2 * filters, filters, 3)
    p["fast3"] = _conv_params(ks[8], frame_l // 2, filters, filters, 1)
    p["b1a"] = _conv_params(ks[9], frame_l // 2, 3 * filters, 2 * filters, 3)
    p["b1b"] = _conv_params(ks[10], frame_l // 2, 2 * filters, 2 * filters, 3)
    p["b2a"] = _conv_params(ks[11], frame_l // 4, 2 * filters, 4 * filters, 3)
    p["b2b"] = _conv_params(ks[12], frame_l // 4, 4 * filters, 4 * filters, 3)
    p["b3a"] = _conv_params(ks[13], frame_l // 8, 4 * filters, 8 * filters, 3)
    p["b3b"] = _conv_params(ks[14], frame_l // 8, 8 * filters, 8 * filters, 3)
    p["lin1"] = _dense_params(ks[15], 8 * filters, 128)
    p["lin2"] = _dense_params(ks[16], 128, 128)
    p["lin3"] = _dense_params(ks[17], 128, class_num)
    return p


if __name__ == "__main__":
    B = 2
    frame_l, joint_n, joint_d = 16, 4, 3
    feat_d = joint_n * (joint_n - 1) // 2   # JCD pairwise-distance features
    filters, class_num = 8, 5

    key = jax.random.PRNGKey(0)
    kp, km, kpose = jax.random.split(key, 3)
    params = init_ddnet_params(kp, frame_l, joint_n, joint_d, feat_d,
                               filters, class_num)
    M = jax.random.normal(km, (B, frame_l, feat_d), jnp.float32)
    P = jax.random.normal(kpose, (B, frame_l, joint_n, joint_d), jnp.float32)

    fwd = build_ddnet_forward(params, B, frame_l, joint_n, joint_d, feat_d,
                              filters, class_num)
    out = jax.block_until_ready(fwd(M, P))
    assert out.shape == (B, class_num), out.shape
    assert bool(jnp.all(jnp.isfinite(out)))
    print("KERNEL_OK")
</pallas_src>

<mosaic_0001>
module attributes {stable_mosaic.version = 11 : i64} {
  func.func @_ddnet_kernel(%arg0: memref<32x6xf32, #tpu.memory_space<vmem>>, %arg1: memref<32x12xf32, #tpu.memory_space<vmem>>, %arg2: memref<1232x128xbf16, #tpu.memory_space<vmem>>, %arg3: memref<736x64xf32, #tpu.memory_space<vmem>>, %arg4: memref<8x128xf32, #tpu.memory_space<vmem>>, %arg5: memref<2x5xf32, #tpu.memory_space<vmem>>, %arg6: memref<32x64xf32, #tpu.memory_space<vmem>>) attributes {dimension_semantics = [], scalar_prefetch = 0 : i64, scratch_operands = 1 : i64, tpu.core_type = #tpu.core_type<tc>} {
    %cst = arith.constant 0.000000e+00 : f32
    %0 = vector.broadcast %cst : f32 to vector<32x64xf32>
    %c0 = arith.constant 0 : index
    %c0_0 = arith.constant 0 : index
    %1 = vector.load %arg6[%c0, %c0_0] : memref<32x64xf32, #tpu.memory_space<vmem>>, vector<32x64xf32>
    tpu.vector_store %arg6[%c0, %c0_0], %0 {strides = array<i32>} : memref<32x64xf32, #tpu.memory_space<vmem>>, vector<32x64xf32>,
    %c0_1 = arith.constant 0 : index
    %c0_2 = arith.constant 0 : index
    %2 = vector.load %arg0[%c0_1, %c0_2] : memref<32x6xf32, #tpu.memory_space<vmem>>, vector<32x6xf32>
    %c0_3 = arith.constant 0 : index
    %c0_4 = arith.constant 0 : index
    %3 = vector.load %arg1[%c0_3, %c0_4] : memref<32x12xf32, #tpu.memory_space<vmem>>, vector<32x12xf32>
    %4 = arith.truncf %3 : vector<32x12xf32> to vector<32x12xbf16>
    %c864 = arith.constant 864 : index
    %c0_5 = arith.constant 0 : index
    %5 = vector.load %arg2[%c864, %c0_5] : memref<1232x128xbf16, #tpu.memory_space<vmem>>, vector<32x32xbf16>
    %cst_6 = arith.constant dense<0.000000e+00> : vector<32x12xf32>
    %6 = tpu.matmul %5, %4, %cst_6 {dimension_numbers = #tpu.dot_dimension_numbers<[1], [0], [0], [1], [0, 0, 1, 1], [], []>} : vector<32x32xbf16>, vector<32x12xbf16>, vector<32x12xf32> -> vector<32x12xf32>
    %c896 = arith.constant 896 : index
    %c0_7 = arith.constant 0 : index
    %7 = vector.load %arg2[%c896, %c0_7] : memref<1232x128xbf16, #tpu.memory_space<vmem>>, vector<16x32xbf16>
    %cst_8 = arith.constant dense<0.000000e+00> : vector<16x12xf32>
    %8 = tpu.matmul %7, %4, %cst_8 {dimension_numbers = #tpu.dot_dimension_numbers<[1], [0], [0], [1], [0, 0, 1, 1], [], []>} : vector<16x32xbf16>, vector<32x12xbf16>, vector<16x12xf32> -> vector<16x12xf32>
    %9 = arith.truncf %2 : vector<32x6xf32> to vector<32x6xbf16>
    %c0_9 = arith.constant 0 : index
    %c0_10 = arith.constant 0 : index
    %10 = vector.load %arg2[%c0_9, %c0_10] : memref<1232x128xbf16, #tpu.memory_space<vmem>>, vector<6x16xbf16>
    %cst_11 = arith.constant dense<0.000000e+00> : vector<32x16xf32>
    %11 = tpu.matmul %9, %10, %cst_11 {dimension_numbers = #tpu.dot_dimension_numbers<[1], [0], [0], [1], [0, 0, 1, 1], [], []>} : vector<32x6xbf16>, vector<6x16xbf16>, vector<32x16xf32> -> vector<32x16xf32>
    %c0_12 = arith.constant 0 : index
    %c0_13 = arith.constant 0 : index
    %12 = vector.load %arg3[%c0_12, %c0_13] : memref<736x64xf32, #tpu.memory_space<vmem>>, vector<32x16xf32>
    %13 = arith.mulf %11, %12 : vector<32x16xf32>
    %c32 = arith.constant 32 : index
    %c0_14 = arith.constant 0 : index
    %14 = vector.load %arg3[%c32, %c0_14] : memref<736x64xf32, #tpu.memory_space<vmem>>, vector<32x16xf32>
    %15 = arith.addf %13, %14 : vector<32x16xf32>
    %cst_15 = arith.constant 2.000000e-01 : f32
    %16 = vector.broadcast %cst_15 : f32 to vector<32x16xf32>
    %17 = arith.mulf %16, %15 : vector<32x16xf32>
    %18 = arith.maximumf %15, %17 : vector<32x16xf32>
    %19 = arith.truncf %18 : vector<32x16xf32> to vector<32x16xbf16>
    %c32_16 = arith.constant 32 : index
    %c0_17 = arith.constant 0 : index
    %20 = vector.load %arg2[%c32_16, %c0_17] : memref<1232x128xbf16, #tpu.memory_space<vmem>>, vector<16x8xbf16>
    %cst_18 = arith.constant dense<0.000000e+00> : vector<32x8xf32>
    %21 = tpu.matmul %19, %20, %cst_18 {dimension_numbers = #tpu.dot_dimension_numbers<[1], [0], [0], [1], [0, 0, 1, 1], [], []>} : vector<32x16xbf16>, vector<16x8xbf16>, vector<32x8xf32> -> vector<32x8xf32>
    %c16 = arith.constant 16 : index
    %c0_19 = arith.constant 0 : index
    %22 = vector.load %arg2[%c16, %c0_19] : memref<1232x128xbf16, #tpu.memory_space<vmem>>, vector<16x8xbf16>
    %cst_20 = arith.constant dense<0.000000e+00> : vector<32x8xf32>
    %23 = tpu.matmul %19, %22, %cst_20 {dimension_numbers = #tpu.dot_dimension_numbers<[1], [0], [0], [1], [0, 0, 1, 1], [], []>} : vector<32x16xbf16>, vector<16x8xbf16>, vector<32x8xf32> -> vector<32x8xf32>
    %c48 = arith.constant 48 : index
    %c0_21 = arith.constant 0 : index
    %24 = vector.load %arg2[%c48, %c0_21] : memref<1232x128xbf16, #tpu.memory_space<vmem>>, vector<16x8xbf16>
    %cst_22 = arith.constant dense<0.000000e+00> : vector<32x8xf32>
    %25 = tpu.matmul %19, %24, %cst_22 {dimension_numbers = #tpu.dot_dimension_numbers<[1], [0], [0], [1], [0, 0, 1, 1], [], []>} : vector<32x16xbf16>, vector<16x8xbf16>, vector<32x8xf32> -> vector<32x8xf32>
    %c608 = arith.constant 608 : index
    %c0_23 = arith.constant 0 : index
    %26 = vector.load %arg3[%c608, %c0_23] : memref<736x64xf32, #tpu.memory_space<vmem>>, vector<32x8xf32>
    %27 = vector.extract_strided_slice %23 {offsets = [31, 0], sizes = [1, 8], strides = [1, 1]} : vector<32x8xf32> to vector<1x8xf32>
    %28 = vector.extract_strided_slice %23 {offsets = [0, 0], sizes = [31, 8], strides = [1, 1]} : vector<32x8xf32> to vector<31x8xf32>
    %29 = tpu.concatenate %27, %28 in 0 : vector<1x8xf32>, vector<31x8xf32> -> vector<32x8xf32>
    %30 = arith.mulf %26, %29 : vector<32x8xf32>
    %31 = arith.addf %21, %30 : vector<32x8xf32>
    %c640 = arith.constant 640 : index
    %c0_24 = arith.constant 0 : index
    %32 = vector.load %arg3[%c640, %c0_24] : memref<736x64xf32, #tpu.memory_space<vmem>>, vector<32x8xf32>
    %33 = vector.extract_strided_slice %25 {offsets = [1, 0], sizes = [31, 8], strides = [1, 1]} : vector<32x8xf32> to vector<31x8xf32>
    %34 = vector.extract_strided_slice %25 {offsets = [0, 0], sizes = [1, 8], strides = [1, 1]} : vector<32x8xf32> to vector<1x8xf32>
    %35 = tpu.concatenate %33, %34 in 0 : vector<31x8xf32>, vector<1x8xf32> -> vector<32x8xf32>
    %36 = arith.mulf %32, %35 : vector<32x8xf32>
    %37 = arith.addf %31, %36 : vector<32x8xf32>
    %c64 = arith.constant 64 : index
    %c0_25 = arith.constant 0 : index
    %38 = vector.load %arg3[%c64, %c0_25] : memref<736x64xf32, #tpu.memory_space<vmem>>, vector<32x8xf32>
    %39 = arith.mulf %37, %38 : vector<32x8xf32>
    %c96 = arith.constant 96 : index
    %c0_26 = arith.constant 0 : index
    %40 = vector.load %arg3[%c96, %c0_26] : memref<736x64xf32, #tpu.memory_space<vmem>>, vector<32x8xf32>
    %41 = arith.addf %39, %40 : vector<32x8xf32>
    %cst_27 = arith.constant 2.000000e-01 : f32
    %42 = vector.broadcast %cst_27 : f32 to vector<32x8xf32>
    %43 = arith.mulf %42, %41 : vector<32x8xf32>
    %44 = arith.maximumf %41, %43 : vector<32x8xf32>
    %45 = arith.truncf %44 : vector<32x8xf32> to vector<32x8xbf16>
    %c64_28 = arith.constant 64 : index
    %c0_29 = arith.constant 0 : index
    %46 = vector.load %arg2[%c64_28, %c0_29] : memref<1232x128xbf16, #tpu.memory_space<vmem>>, vector<8x8xbf16>
    %cst_30 = arith.constant dense<0.000000e+00> : vector<32x8xf32>
    %47 = tpu.matmul %45, %46, %cst_30 {dimension_numbers = #tpu.dot_dimension_numbers<[1], [0], [0], [1], [0, 0, 1, 1], [], []>} : vector<32x8xbf16>, vector<8x8xbf16>, vector<32x8xf32> -> vector<32x8xf32>
    %c128 = arith.constant 128 : index
    %c0_31 = arith.constant 0 : index
    %48 = vector.load %arg3[%c128, %c0_31] : memref<736x64xf32, #tpu.memory_space<vmem>>, vector<32x8xf32>
    %49 = arith.mulf %47, %48 : vector<32x8xf32>
    %c160 = arith.constant 160 : index
    %c0_32 = arith.constant 0 : index
    %50 = vector.load %arg3[%c160, %c0_32] : memref<736x64xf32, #tpu.memory_space<vmem>>, vector<32x8xf32>
    %51 = arith.addf %49, %50 : vector<32x8xf32>
    %cst_33 = arith.constant 2.000000e-01 : f32
    %52 = vector.broadcast %cst_33 : f32 to vector<32x8xf32>
    %53 = arith.mulf %52, %51 : vector<32x8xf32>
    %54 = arith.maximumf %51, %53 : vector<32x8xf32>
    %c0_34 = arith.constant 0 : index
    %c0_35 = arith.constant 0 : index
    %55 = vector.load %arg6[%c0_34, %c0_35] : memref<32x64xf32, #tpu.memory_space<vmem>>, vector<32x8xf32>
    tpu.vector_store %arg6[%c0_34, %c0_35], %54 {strides = array<i32>} : memref<32x64xf32, #tpu.memory_space<vmem>>, vector<32x8xf32>,
    %c0_36 = arith.constant 0 : index
    %c0_37 = arith.constant 0 : index
    %56 = tpu.strided_load %arg6[%c0_36, %c0_37] {strides = array<i32: 2, 1>} : memref<32x64xf32, #tpu.memory_space<vmem>>, vector<16x64xf32>
    %c1 = arith.constant 1 : index
    %c0_38 = arith.constant 0 : index
    %57 = tpu.strided_load %arg6[%c1, %c0_38] {strides = array<i32: 2, 1>} : memref<32x64xf32, #tpu.memory_space<vmem>>, vector<16x64xf32>
    %58 = arith.maximumf %56, %57 : vector<16x64xf32>
    %59 = vector.extract_strided_slice %58 {offsets = [0, 0], sizes = [16, 8], strides = [1, 1]} : vector<16x64xf32> to vector<16x8xf32>
    %60 = arith.truncf %6 : vector<32x12xf32> to vector<32x12xbf16>
    %c80 = arith.constant 80 : index
    %c0_39 = arith.constant 0 : index
    %61 = vector.load %arg2[%c80, %c0_39] : memref<1232x128xbf16, #tpu.memory_space<vmem>>, vector<12x16xbf16>
    %cst_40 = arith.constant dense<0.000000e+00> : vector<32x16xf32>
    %62 = tpu.matmul %60, %61, %cst_40 {dimension_numbers = #tpu.dot_dimension_numbers<[1], [0], [0], [1], [0, 0, 1, 1], [], []>} : vector<32x12xbf16>, vector<12x16xbf16>, vector<32x16xf32> -> vector<32x16xf32>
    %c192 = arith.constant 192 : index
    %c0_41 = arith.constant 0 : index
    %63 = vector.load %arg3[%c192, %c0_41] : memref<736x64xf32, #tpu.memory_space<vmem>>, vector<32x16xf32>
    %64 = arith.mulf %62, %63 : vector<32x16xf32>
    %c224 = arith.constant 224 : index
    %c0_42 = arith.constant 0 : index
    %65 = vector.load %arg3[%c224, %c0_42] : memref<736x64xf32, #tpu.memory_space<vmem>>, vector<32x16xf32>
    %66 = arith.addf %64, %65 : vector<32x16xf32>
    %cst_43 = arith.constant 2.000000e-01 : f32
    %67 = vector.broadcast %cst_43 : f32 to vector<32x16xf32>
    %68 = arith.mulf %67, %66 : vector<32x16xf32>
    %69 = arith.maximumf %66, %68 : vector<32x16xf32>
    %70 = arith.truncf %69 : vector<32x16xf32> to vector<32x16xbf16>
    %c112 = arith.constant 112 : index
    %c0_44 = arith.constant 0 : index
    %71 = vector.load %arg2[%c112, %c0_44] : memref<1232x128xbf16, #tpu.memory_space<vmem>>, vector<16x8xbf16>
    %cst_45 = arith.constant dense<0.000000e+00> : vector<32x8xf32>
    %72 = tpu.matmul %70, %71, %cst_45 {dimension_numbers = #tpu.dot_dimension_numbers<[1], [0], [0], [1], [0, 0, 1, 1], [], []>} : vector<32x16xbf16>, vector<16x8xbf16>, vector<32x8xf32> -> vector<32x8xf32>
    %c96_46 = arith.constant 96 : index
    %c0_47 = arith.constant 0 : index
    %73 = vector.load %arg2[%c96_46, %c0_47] : memref<1232x128xbf16, #tpu.memory_space<vmem>>, vector<16x8xbf16>
    %cst_48 = arith.constant dense<0.000000e+00> : vector<32x8xf32>
    %74 = tpu.matmul %70, %73, %cst_48 {dimension_numbers = #tpu.dot_dimension_numbers<[1], [0], [0], [1], [0, 0, 1, 1], [], []>} : vector<32x16xbf16>, vector<16x8xbf16>, vector<32x8xf32> -> vector<32x8xf32>
    %c128_49 = arith.constant 128 : index
    %c0_50 = arith.constant 0 : index
    %75 = vector.load %arg2[%c128_49, %c0_50] : memref<1232x128xbf16, #tpu.memory_space<vmem>>, vector<16x8xbf16>
    %cst_51 = arith.constant dense<0.000000e+00> : vector<32x8xf32>
    %76 = tpu.matmul %70, %75, %cst_51 {dimension_numbers = #tpu.dot_dimension_numbers<[1], [0], [0], [1], [0, 0, 1, 1], [], []>} : vector<32x16xbf16>, vector<16x8xbf16>, vector<32x8xf32> -> vector<32x8xf32>
    %c608_52 = arith.constant 608 : index
    %c0_53 = arith.constant 0 : index
    %77 = vector.load %arg3[%c608_52, %c0_53] : memref<736x64xf32, #tpu.memory_space<vmem>>, vector<32x8xf32>
    %78 = vector.extract_strided_slice %74 {offsets = [31, 0], sizes = [1, 8], strides = [1, 1]} : vector<32x8xf32> to vector<1x8xf32>
    %79 = vector.extract_strided_slice %74 {offsets = [0, 0], sizes = [31, 8], strides = [1, 1]} : vector<32x8xf32> to vector<31x8xf32>
    %80 = tpu.concatenate %78, %79 in 0 : vector<1x8xf32>, vector<31x8xf32> -> vector<32x8xf32>
    %81 = arith.mulf %77, %80 : vector<32x8xf32>
    %82 = arith.addf %72, %81 : vector<32x8xf32>
    %c640_54 = arith.constant 640 : index
    %c0_55 = arith.constant 0 : index
    %83 = vector.load %arg3[%c640_54, %c0_55] : memref<736x64xf32, #tpu.memory_space<vmem>>, vector<32x8xf32>
    %84 = vector.extract_strided_slice %76 {offsets = [1, 0], sizes = [31, 8], strides = [1, 1]} : vector<32x8xf32> to vector<31x8xf32>
    %85 = vector.extract_strided_slice %76 {offsets = [0, 0], sizes = [1, 8], strides = [1, 1]} : vector<32x8xf32> to vector<1x8xf32>
    %86 = tpu.concatenate %84, %85 in 0 : vector<31x8xf32>, vector<1x8xf32> -> vector<32x8xf32>
    %87 = arith.mulf %83, %86 : vector<32x8xf32>
    %88 = arith.addf %82, %87 : vector<32x8xf32>
    %c256 = arith.constant 256 : index
    %c0_56 = arith.constant 0 : index
    %89 = vector.load %arg3[%c256, %c0_56] : memref<736x64xf32, #tpu.memory_space<vmem>>, vector<32x8xf32>
    %90 = arith.mulf %88, %89 : vector<32x8xf32>
    %c288 = arith.constant 288 : index
    %c0_57 = arith.constant 0 : index
    %91 = vector.load %arg3[%c288, %c0_57] : memref<736x64xf32, #tpu.memory_space<vmem>>, vector<32x8xf32>
    %92 = arith.addf %90, %91 : vector<32x8xf32>
    %cst_58 = arith.constant 2.000000e-01 : f32
    %93 = vector.broadcast %cst_58 : f32 to vector<32x8xf32>
    %94 = arith.mulf %93, %92 : vector<32x8xf32>
    %95 = arith.maximumf %92, %94 : vector<32x8xf32>
    %96 = arith.truncf %95 : vector<32x8xf32> to vector<32x8xbf16>
    %c144 = arith.constant 144 : index
    %c0_59 = arith.constant 0 : index
    %97 = vector.load %arg2[%c144, %c0_59] : memref<1232x128xbf16, #tpu.memory_space<vmem>>, vector<8x8xbf16>
    %cst_60 = arith.constant dense<0.000000e+00> : vector<32x8xf32>
    %98 = tpu.matmul %96, %97, %cst_60 {dimension_numbers = #tpu.dot_dimension_numbers<[1], [0], [0], [1], [0, 0, 1, 1], [], []>} : vector<32x8xbf16>, vector<8x8xbf16>, vector<32x8xf32> -> vector<32x8xf32>
    %c320 = arith.constant 320 : index
    %c0_61 = arith.constant 0 : index
    %99 = vector.load %arg3[%c320, %c0_61] : memref<736x64xf32, #tpu.memory_space<vmem>>, vector<32x8xf32>
    %100 = arith.mulf %98, %99 : vector<32x8xf32>
    %c352 = arith.constant 352 : index
    %c0_62 = arith.constant 0 : index
    %101 = vector.load %arg3[%c352, %c0_62] : memref<736x64xf32, #tpu.memory_space<vmem>>, vector<32x8xf32>
    %102 = arith.addf %100, %101 : vector<32x8xf32>
    %cst_63 = arith.constant 2.000000e-01 : f32
    %103 = vector.broadcast %cst_63 : f32 to vector<32x8xf32>
    %104 = arith.mulf %103, %102 : vector<32x8xf32>
    %105 = arith.maximumf %102, %104 : vector<32x8xf32>
    %c0_64 = arith.constant 0 : index
    %c0_65 = arith.constant 0 : index
    %106 = vector.load %arg6[%c0_64, %c0_65] : memref<32x64xf32, #tpu.memory_space<vmem>>, vector<32x8xf32>
    tpu.vector_store %arg6[%c0_64, %c0_65], %105 {strides = array<i32>} : memref<32x64xf32, #tpu.memory_space<vmem>>, vector<32x8xf32>,
    %c0_66 = arith.constant 0 : index
    %c0_67 = arith.constant 0 : index
    %107 = tpu.strided_load %arg6[%c0_66, %c0_67] {strides = array<i32: 2, 1>} : memref<32x64xf32, #tpu.memory_space<vmem>>, vector<16x64xf32>
    %c1_68 = arith.constant 1 : index
    %c0_69 = arith.constant 0 : index
    %108 = tpu.strided_load %arg6[%c1_68, %c0_69] {strides = array<i32: 2, 1>} : memref<32x64xf32, #tpu.memory_space<vmem>>, vector<16x64xf32>
    %109 = arith.maximumf %107, %108 : vector<16x64xf32>
    %110 = vector.extract_strided_slice %109 {offsets = [0, 0], sizes = [16, 8], strides = [1, 1]} : vector<16x64xf32> to vector<16x8xf32>
    %111 = arith.truncf %8 : vector<16x12xf32> to vector<16x12xbf16>
    %c160_70 = arith.constant 160 : index
    %c0_71 = arith.constant 0 : index
    %112 = vector.load %arg2[%c160_70, %c0_71] : memref<1232x128xbf16, #tpu.memory_space<vmem>>, vector<12x16xbf16>
    %cst_72 = arith.constant dense<0.000000e+00> : vector<16x16xf32>
    %113 = tpu.matmul %111, %112, %cst_72 {dimension_numbers = #tpu.dot_dimension_numbers<[1], [0], [0], [1], [0, 0, 1, 1], [], []>} : vector<16x12xbf16>, vector<12x16xbf16>, vector<16x16xf32> -> vector<16x16xf32>
    %c384 = arith.constant 384 : index
    %c0_73 = arith.constant 0 : index
    %114 = vector.load %arg3[%c384, %c0_73] : memref<736x64xf32, #tpu.memory_space<vmem>>, vector<16x16xf32>
    %115 = arith.mulf %113, %114 : vector<16x16xf32>
    %c400 = arith.constant 400 : index
    %c0_74 = arith.constant 0 : index
    %116 = vector.load %arg3[%c400, %c0_74] : memref<736x64xf32, #tpu.memory_space<vmem>>, vector<16x16xf32>
    %117 = arith.addf %115, %116 : vector<16x16xf32>
    %cst_75 = arith.constant 2.000000e-01 : f32
    %118 = vector.broadcast %cst_75 : f32 to vector<16x16xf32>
    %119 = arith.mulf %118, %117 : vector<16x16xf32>
    %120 = arith.maximumf %117, %119 : vector<16x16xf32>
    %121 = arith.truncf %120 : vector<16x16xf32> to vector<16x16xbf16>
    %c192_76 = arith.constant 192 : index
    %c0_77 = arith.constant 0 : index
    %122 = vector.load %arg2[%c192_76, %c0_77] : memref<1232x128xbf16, #tpu.memory_space<vmem>>, vector<16x8xbf16>
    %cst_78 = arith.constant dense<0.000000e+00> : vector<16x8xf32>
    %123 = tpu.matmul %121, %122, %cst_78 {dimension_numbers = #tpu.dot_dimension_numbers<[1], [0], [0], [1], [0, 0, 1, 1], [], []>} : vector<16x16xbf16>, vector<16x8xbf16>, vector<16x8xf32> -> vector<16x8xf32>
    %c176 = arith.constant 176 : index
    %c0_79 = arith.constant 0 : index
    %124 = vector.load %arg2[%c176, %c0_79] : memref<1232x128xbf16, #tpu.memory_space<vmem>>, vector<16x8xbf16>
    %cst_80 = arith.constant dense<0.000000e+00> : vector<16x8xf32>
    %125 = tpu.matmul %121, %124, %cst_80 {dimension_numbers = #tpu.dot_dimension_numbers<[1], [0], [0], [1], [0, 0, 1, 1], [], []>} : vector<16x16xbf16>, vector<16x8xbf16>, vector<16x8xf32> -> vector<16x8xf32>
    %c208 = arith.constant 208 : index
    %c0_81 = arith.constant 0 : index
    %126 = vector.load %arg2[%c208, %c0_81] : memref<1232x128xbf16, #tpu.memory_space<vmem>>, vector<16x8xbf16>
    %cst_82 = arith.constant dense<0.000000e+00> : vector<16x8xf32>
    %127 = tpu.matmul %121, %126, %cst_82 {dimension_numbers = #tpu.dot_dimension_numbers<[1], [0], [0], [1], [0, 0, 1, 1], [], []>} : vector<16x16xbf16>, vector<16x8xbf16>, vector<16x8xf32> -> vector<16x8xf32>
    %c672 = arith.constant 672 : index
    %c0_83 = arith.constant 0 : index
    %128 = vector.load %arg3[%c672, %c0_83] : memref<736x64xf32, #tpu.memory_space<vmem>>, vector<16x8xf32>
    %129 = vector.extract_strided_slice %125 {offsets = [15, 0], sizes = [1, 8], strides = [1, 1]} : vector<16x8xf32> to vector<1x8xf32>
    %130 = vector.extract_strided_slice %125 {offsets = [0, 0], sizes = [15, 8], strides = [1, 1]} : vector<16x8xf32> to vector<15x8xf32>
    %131 = tpu.concatenate %129, %130 in 0 : vector<1x8xf32>, vector<15x8xf32> -> vector<16x8xf32>
    %132 = arith.mulf %128, %131 : vector<16x8xf32>
    %133 = arith.addf %123, %132 : vector<16x8xf32>
    %c688 = arith.constant 688 : index
    %c0_84 = arith.constant 0 : index
    %134 = vector.load %arg3[%c688, %c0_84] : memref<736x64xf32, #tpu.memory_space<vmem>>, vector<16x8xf32>
    %135 = vector.extract_strided_slice %127 {offsets = [1, 0], sizes = [15, 8], strides = [1, 1]} : vector<16x8xf32> to vector<15x8xf32>
    %136 = vector.extract_strided_slice %127 {offsets = [0, 0], sizes = [1, 8], strides = [1, 1]} : vector<16x8xf32> to vector<1x8xf32>
    %137 = tpu.concatenate %135, %136 in 0 : vector<15x8xf32>, vector<1x8xf32> -> vector<16x8xf32>
    %138 = arith.mulf %134, %137 : vector<16x8xf32>
    %139 = arith.addf %133, %138 : vector<16x8xf32>
    %c416 = arith.constant 416 : index
    %c0_85 = arith.constant 0 : index
    %140 = vector.load %arg3[%c416, %c0_85] : memref<736x64xf32, #tpu.memory_space<vmem>>, vector<16x8xf32>
    %141 = arith.mulf %139, %140 : vector<16x8xf32>
    %c432 = arith.constant 432 : index
    %c0_86 = arith.constant 0 : index
    %142 = vector.load %arg3[%c432, %c0_86] : memref<736x64xf32, #tpu.memory_space<vmem>>, vector<16x8xf32>
    %143 = arith.addf %141, %142 : vector<16x8xf32>
    %cst_87 = arith.constant 2.000000e-01 : f32
    %144 = vector.broadcast %cst_87 : f32 to vector<16x8xf32>
    %145 = arith.mulf %144, %143 : vector<16x8xf32>
    %146 = arith.maximumf %143, %145 : vector<16x8xf32>
    %147 = arith.truncf %146 : vector<16x8xf32> to vector<16x8xbf16>
    %c224_88 = arith.constant 224 : index
    %c0_89 = arith.constant 0 : index
    %148 = vector.load %arg2[%c224_88, %c0_89] : memref<1232x128xbf16, #tpu.memory_space<vmem>>, vector<8x8xbf16>
    %cst_90 = arith.constant dense<0.000000e+00> : vector<16x8xf32>
    %149 = tpu.matmul %147, %148, %cst_90 {dimension_numbers = #tpu.dot_dimension_numbers<[1], [0], [0], [1], [0, 0, 1, 1], [], []>} : vector<16x8xbf16>, vector<8x8xbf16>, vector<16x8xf32> -> vector<16x8xf32>
    %c448 = arith.constant 448 : index
    %c0_91 = arith.constant 0 : index
    %150 = vector.load %arg3[%c448, %c0_91] : memref<736x64xf32, #tpu.memory_space<vmem>>, vector<16x8xf32>
    %151 = arith.mulf %149, %150 : vector<16x8xf32>
    %c464 = arith.constant 464 : index
    %c0_92 = arith.constant 0 : index
    %152 = vector.load %arg3[%c464, %c0_92] : memref<736x64xf32, #tpu.memory_space<vmem>>, vector<16x8xf32>
    %153 = arith.addf %151, %152 : vector<16x8xf32>
    %cst_93 = arith.constant 2.000000e-01 : f32
    %154 = vector.broadcast %cst_93 : f32 to vector<16x8xf32>
    %155 = arith.mulf %154, %153 : vector<16x8xf32>
    %156 = arith.maximumf %153, %155 : vector<16x8xf32>
    %157 = arith.truncf %59 : vector<16x8xf32> to vector<16x8xbf16>
    %c256_94 = arith.constant 256 : index
    %c0_95 = arith.constant 0 : index
    %158 = vector.load %arg2[%c256_94, %c0_95] : memref<1232x128xbf16, #tpu.memory_space<vmem>>, vector<8x16xbf16>
    %cst_96 = arith.constant dense<0.000000e+00> : vector<16x16xf32>
    %159 = tpu.matmul %157, %158, %cst_96 {dimension_numbers = #tpu.dot_dimension_numbers<[1], [0], [0], [1], [0, 0, 1, 1], [], []>} : vector<16x8xbf16>, vector<8x16xbf16>, vector<16x16xf32> -> vector<16x16xf32>
    %c240 = arith.constant 240 : index
    %c0_97 = arith.constant 0 : index
    %160 = vector.load %arg2[%c240, %c0_97] : memref<1232x128xbf16, #tpu.memory_space<vmem>>, vector<8x16xbf16>
    %cst_98 = arith.constant dense<0.000000e+00> : vector<16x16xf32>
    %161 = tpu.matmul %157, %160, %cst_98 {dimension_numbers = #tpu.dot_dimension_numbers<[1], [0], [0], [1], [0, 0, 1, 1], [], []>} : vector<16x8xbf16>, vector<8x16xbf16>, vector<16x16xf32> -> vector<16x16xf32>
    %c272 = arith.constant 272 : index
    %c0_99 = arith.constant 0 : index
    %162 = vector.load %arg2[%c272, %c0_99] : memref<1232x128xbf16, #tpu.memory_space<vmem>>, vector<8x16xbf16>
    %cst_100 = arith.constant dense<0.000000e+00> : vector<16x16xf32>
    %163 = tpu.matmul %157, %162, %cst_100 {dimension_numbers = #tpu.dot_dimension_numbers<[1], [0], [0], [1], [0, 0, 1, 1], [], []>} : vector<16x8xbf16>, vector<8x16xbf16>, vector<16x16xf32> -> vector<16x16xf32>
    %c672_101 = arith.constant 672 : index
    %c0_102 = arith.constant 0 : index
    %164 = vector.load %arg3[%c672_101, %c0_102] : memref<736x64xf32, #tpu.memory_space<vmem>>, vector<16x16xf32>
    %165 = vector.extract_strided_slice %161 {offsets = [15, 0], sizes = [1, 16], strides = [1, 1]} : vector<16x16xf32> to vector<1x16xf32>
    %166 = vector.extract_strided_slice %161 {offsets = [0, 0], sizes = [15, 16], strides = [1, 1]} : vector<16x16xf32> to vector<15x16xf32>
    %167 = tpu.concatenate %165, %166 in 0 : vector<1x16xf32>, vector<15x16xf32> -> vector<16x16xf32>
    %168 = arith.mulf %164, %167 : vector<16x16xf32>
    %169 = arith.addf %159, %168 : vector<16x16xf32>
    %c688_103 = arith.constant 688 : index
    %c0_104 = arith.constant 0 : index
    %170 = vector.load %arg3[%c688_103, %c0_104] : memref<736x64xf32, #tpu.memory_space<vmem>>, vector<16x16xf32>
    %171 = vector.extract_strided_slice %163 {offsets = [1, 0], sizes = [15, 16], strides = [1, 1]} : vector<16x16xf32> to vector<15x16xf32>
    %172 = vector.extract_strided_slice %163 {offsets = [0, 0], sizes = [1, 16], strides = [1, 1]} : vector<16x16xf32> to vector<1x16xf32>
    %173 = tpu.concatenate %171, %172 in 0 : vector<15x16xf32>, vector<1x16xf32> -> vector<16x16xf32>
    %174 = arith.mulf %170, %173 : vector<16x16xf32>
    %175 = arith.addf %169, %174 : vector<16x16xf32>
    %176 = arith.truncf %110 : vector<16x8xf32> to vector<16x8xbf16>
    %c304 = arith.constant 304 : index
    %c0_105 = arith.constant 0 : index
    %177 = vector.load %arg2[%c304, %c0_105] : memref<1232x128xbf16, #tpu.memory_space<vmem>>, vector<8x16xbf16>
    %cst_106 = arith.constant dense<0.000000e+00> : vector<16x16xf32>
    %178 = tpu.matmul %176, %177, %cst_106 {dimension_numbers = #tpu.dot_dimension_numbers<[1], [0], [0], [1], [0, 0, 1, 1], [], []>} : vector<16x8xbf16>, vector<8x16xbf16>, vector<16x16xf32> -> vector<16x16xf32>
    %179 = arith.addf %175, %178 : vector<16x16xf32>
    %c288_107 = arith.constant 288 : index
    %c0_108 = arith.constant 0 : index
    %180 = vector.load %arg2[%c288_107, %c0_108] : memref<1232x128xbf16, #tpu.memory_space<vmem>>, vector<8x16xbf16>
    %cst_109 = arith.constant dense<0.000000e+00> : vector<16x16xf32>
    %181 = tpu.matmul %176, %180, %cst_109 {dimension_numbers = #tpu.dot_dimension_numbers<[1], [0], [0], [1], [0, 0, 1, 1], [], []>} : vector<16x8xbf16>, vector<8x16xbf16>, vector<16x16xf32> -> vector<16x16xf32>
    %c320_110 = arith.constant 320 : index
    %c0_111 = arith.constant 0 : index
    %182 = vector.load %arg2[%c320_110, %c0_111] : memref<1232x128xbf16, #tpu.memory_space<vmem>>, vector<8x16xbf16>
    %cst_112 = arith.constant dense<0.000000e+00> : vector<16x16xf32>
    %183 = tpu.matmul %176, %182, %cst_112 {dimension_numbers = #tpu.dot_dimension_numbers<[1], [0], [0], [1], [0, 0, 1, 1], [], []>} : vector<16x8xbf16>, vector<8x16xbf16>, vector<16x16xf32> -> vector<16x16xf32>
    %c672_113 = arith.constant 672 : index
    %c0_114 = arith.constant 0 : index
    %184 = vector.load %arg3[%c672_113, %c0_114] : memref<736x64xf32, #tpu.memory_space<vmem>>, vector<16x16xf32>
    %185 = vector.extract_strided_slice %181 {offsets = [15, 0], sizes = [1, 16], strides = [1, 1]} : vector<16x16xf32> to vector<1x16xf32>
    %186 = vector.extract_strided_slice %181 {offsets = [0, 0], sizes = [15, 16], strides = [1, 1]} : vector<16x16xf32> to vector<15x16xf32>
    %187 = tpu.concatenate %185, %186 in 0 : vector<1x16xf32>, vector<15x16xf32> -> vector<16x16xf32>
    %188 = arith.mulf %184, %187 : vector<16x16xf32>
    %189 = arith.addf %179, %188 : vector<16x16xf32>
    %c688_115 = arith.constant 688 : index
    %c0_116 = arith.constant 0 : index
    %190 = vector.load %arg3[%c688_115, %c0_116] : memref<736x64xf32, #tpu.memory_space<vmem>>, vector<16x16xf32>
    %191 = vector.extract_strided_slice %183 {offsets = [1, 0], sizes = [15, 16], strides = [1, 1]} : vector<16x16xf32> to vector<15x16xf32>
    %192 = vector.extract_strided_slice %183 {offsets = [0, 0], sizes = [1, 16], strides = [1, 1]} : vector<16x16xf32> to vector<1x16xf32>
    %193 = tpu.concatenate %191, %192 in 0 : vector<15x16xf32>, vector<1x16xf32> -> vector<16x16xf32>
    %194 = arith.mulf %190, %193 : vector<16x16xf32>
    %195 = arith.addf %189, %194 : vector<16x16xf32>
    %196 = arith.truncf %156 : vector<16x8xf32> to vector<16x8xbf16>
    %c352_117 = arith.constant 352 : index
    %c0_118 = arith.constant 0 : index
    %197 = vector.load %arg2[%c352_117, %c0_118] : memref<1232x128xbf16, #tpu.memory_space<vmem>>, vector<8x16xbf16>
    %cst_119 = arith.constant dense<0.000000e+00> : vector<16x16xf32>
    %198 = tpu.matmul %196, %197, %cst_119 {dimension_numbers = #tpu.dot_dimension_numbers<[1], [0], [0], [1], [0, 0, 1, 1], [], []>} : vector<16x8xbf16>, vector<8x16xbf16>, vector<16x16xf32> -> vector<16x16xf32>
    %199 = arith.addf %195, %198 : vector<16x16xf32>
    %c336 = arith.constant 336 : index
    %c0_120 = arith.constant 0 : index
    %200 = vector.load %arg2[%c336, %c0_120] : memref<1232x128xbf16, #tpu.memory_space<vmem>>, vector<8x16xbf16>
    %cst_121 = arith.constant dense<0.000000e+00> : vector<16x16xf32>
    %201 = tpu.matmul %196, %200, %cst_121 {dimension_numbers = #tpu.dot_dimension_numbers<[1], [0], [0], [1], [0, 0, 1, 1], [], []>} : vector<16x8xbf16>, vector<8x16xbf16>, vector<16x16xf32> -> vector<16x16xf32>
    %c368 = arith.constant 368 : index
    %c0_122 = arith.constant 0 : index
    %202 = vector.load %arg2[%c368, %c0_122] : memref<1232x128xbf16, #tpu.memory_space<vmem>>, vector<8x16xbf16>
    %cst_123 = arith.constant dense<0.000000e+00> : vector<16x16xf32>
    %203 = tpu.matmul %196, %202, %cst_123 {dimension_numbers = #tpu.dot_dimension_numbers<[1], [0], [0], [1], [0, 0, 1, 1], [], []>} : vector<16x8xbf16>, vector<8x16xbf16>, vector<16x16xf32> -> vector<16x16xf32>
    %c672_124 = arith.constant 672 : index
    %c0_125 = arith.constant 0 : index
    %204 = vector.load %arg3[%c672_124, %c0_125] : memref<736x64xf32, #tpu.memory_space<vmem>>, vector<16x16xf32>
    %205 = vector.extract_strided_slice %201 {offsets = [15, 0], sizes = [1, 16], strides = [1, 1]} : vector<16x16xf32> to vector<1x16xf32>
    %206 = vector.extract_strided_slice %201 {offsets = [0, 0], sizes = [15, 16], strides = [1, 1]} : vector<16x16xf32> to vector<15x16xf32>
    %207 = tpu.concatenate %205, %206 in 0 : vector<1x16xf32>, vector<15x16xf32> -> vector<16x16xf32>
    %208 = arith.mulf %204, %207 : vector<16x16xf32>
    %209 = arith.addf %199, %208 : vector<16x16xf32>
    %c688_126 = arith.constant 688 : index
    %c0_127 = arith.constant 0 : index
    %210 = vector.load %arg3[%c688_126, %c0_127] : memref<736x64xf32, #tpu.memory_space<vmem>>, vector<16x16xf32>
    %211 = vector.extract_strided_slice %203 {offsets = [1, 0], sizes = [15, 16], strides = [1, 1]} : vector<16x16xf32> to vector<15x16xf32>
    %212 = vector.extract_strided_slice %203 {offsets = [0, 0], sizes = [1, 16], strides = [1, 1]} : vector<16x16xf32> to vector<1x16xf32>
    %213 = tpu.concatenate %211, %212 in 0 : vector<15x16xf32>, vector<1x16xf32> -> vector<16x16xf32>
    %214 = arith.mulf %210, %213 : vector<16x16xf32>
    %215 = arith.addf %209, %214 : vector<16x16xf32>
    %c480 = arith.constant 480 : index
    %c0_128 = arith.constant 0 : index
    %216 = vector.load %arg3[%c480, %c0_128] : memref<736x64xf32, #tpu.memory_space<vmem>>, vector<16x16xf32>
    %217 = arith.mulf %215, %216 : vector<16x16xf32>
    %c496 = arith.constant 496 : index
    %c0_129 = arith.constant 0 : index
    %218 = vector.load %arg3[%c496, %c0_129] : memref<736x64xf32, #tpu.memory_space<vmem>>, vector<16x16xf32>
    %219 = arith.addf %217, %218 : vector<16x16xf32>
    %cst_130 = arith.constant 2.000000e-01 : f32
    %220 = vector.broadcast %cst_130 : f32 to vector<16x16xf32>
    %221 = arith.mulf %220, %219 : vector<16x16xf32>
    %222 = arith.maximumf %219, %221 : vector<16x16xf32>
    %223 = arith.truncf %222 : vector<16x16xf32> to vector<16x16xbf16>
    %c400_131 = arith.constant 400 : index
    %c0_132 = arith.constant 0 : index
    %224 = vector.load %arg2[%c400_131, %c0_132] : memref<1232x128xbf16, #tpu.memory_space<vmem>>, vector<16x16xbf16>
    %cst_133 = arith.constant dense<0.000000e+00> : vector<16x16xf32>
    %225 = tpu.matmul %223, %224, %cst_133 {dimension_numbers = #tpu.dot_dimension_numbers<[1], [0], [0], [1], [0, 0, 1, 1], [], []>} : vector<16x16xbf16>, vector<16x16xbf16>, vector<16x16xf32> -> vector<16x16xf32>
    %c384_134 = arith.constant 384 : index
    %c0_135 = arith.constant 0 : index
    %226 = vector.load %arg2[%c384_134, %c0_135] : memref<1232x128xbf16, #tpu.memory_space<vmem>>, vector<16x16xbf16>
    %cst_136 = arith.constant dense<0.000000e+00> : vector<16x16xf32>
    %227 = tpu.matmul %223, %226, %cst_136 {dimension_numbers = #tpu.dot_dimension_numbers<[1], [0], [0], [1], [0, 0, 1, 1], [], []>} : vector<16x16xbf16>, vector<16x16xbf16>, vector<16x16xf32> -> vector<16x16xf32>
    %c416_137 = arith.constant 416 : index
    %c0_138 = arith.constant 0 : index
    %228 = vector.load %arg2[%c416_137, %c0_138] : memref<1232x128xbf16, #tpu.memory_space<vmem>>, vector<16x16xbf16>
    %cst_139 = arith.constant dense<0.000000e+00> : vector<16x16xf32>
    %229 = tpu.matmul %223, %228, %cst_139 {dimension_numbers = #tpu.dot_dimension_numbers<[1], [0], [0], [1], [0, 0, 1, 1], [], []>} : vector<16x16xbf16>, vector<16x16xbf16>, vector<16x16xf32> -> vector<16x16xf32>
    %c672_140 = arith.constant 672 : index
    %c0_141 = arith.constant 0 : index
    %230 = vector.load %arg3[%c672_140, %c0_141] : memref<736x64xf32, #tpu.memory_space<vmem>>, vector<16x16xf32>
    %231 = vector.extract_strided_slice %227 {offsets = [15, 0], sizes = [1, 16], strides = [1, 1]} : vector<16x16xf32> to vector<1x16xf32>
    %232 = vector.extract_strided_slice %227 {offsets = [0, 0], sizes = [15, 16], strides = [1, 1]} : vector<16x16xf32> to vector<15x16xf32>
    %233 = tpu.concatenate %231, %232 in 0 : vector<1x16xf32>, vector<15x16xf32> -> vector<16x16xf32>
    %234 = arith.mulf %230, %233 : vector<16x16xf32>
    %235 = arith.addf %225, %234 : vector<16x16xf32>
    %c688_142 = arith.constant 688 : index
    %c0_143 = arith.constant 0 : index
    %236 = vector.load %arg3[%c688_142, %c0_143] : memref<736x64xf32, #tpu.memory_space<vmem>>, vector<16x16xf32>
    %237 = vector.extract_strided_slice %229 {offsets = [1, 0], sizes = [15, 16], strides = [1, 1]} : vector<16x16xf32> to vector<15x16xf32>
    %238 = vector.extract_strided_slice %229 {offsets = [0, 0], sizes = [1, 16], strides = [1, 1]} : vector<16x16xf32> to vector<1x16xf32>
    %239 = tpu.concatenate %237, %238 in 0 : vector<15x16xf32>, vector<1x16xf32> -> vector<16x16xf32>
    %240 = arith.mulf %236, %239 : vector<16x16xf32>
    %241 = arith.addf %235, %240 : vector<16x16xf32>
    %c512 = arith.constant 512 : index
    %c0_144 = arith.constant 0 : index
    %242 = vector.load %arg3[%c512, %c0_144] : memref<736x64xf32, #tpu.memory_space<vmem>>, vector<16x16xf32>
    %243 = arith.mulf %241, %242 : vector<16x16xf32>
    %c528 = arith.constant 528 : index
    %c0_145 = arith.constant 0 : index
    %244 = vector.load %arg3[%c528, %c0_145] : memref<736x64xf32, #tpu.memory_space<vmem>>, vector<16x16xf32>
    %245 = arith.addf %243, %244 : vector<16x16xf32>
    %cst_146 = arith.constant 2.000000e-01 : f32
    %246 = vector.broadcast %cst_146 : f32 to vector<16x16xf32>
    %247 = arith.mulf %246, %245 : vector<16x16xf32>
    %248 = arith.maximumf %245, %247 : vector<16x16xf32>
    %c0_147 = arith.constant 0 : index
    %c0_148 = arith.constant 0 : index
    %249 = vector.load %arg6[%c0_147, %c0_148] : memref<32x64xf32, #tpu.memory_space<vmem>>, vector<16x16xf32>
    tpu.vector_store %arg6[%c0_147, %c0_148], %248 {strides = array<i32>} : memref<32x64xf32, #tpu.memory_space<vmem>>, vector<16x16xf32>,
    %c0_149 = arith.constant 0 : index
    %c0_150 = arith.constant 0 : index
    %250 = tpu.strided_load %arg6[%c0_149, %c0_150] {strides = array<i32: 2, 1>} : memref<32x64xf32, #tpu.memory_space<vmem>>, vector<8x64xf32>
    %c1_151 = arith.constant 1 : index
    %c0_152 = arith.constant 0 : index
    %251 = tpu.strided_load %arg6[%c1_151, %c0_152] {strides = array<i32: 2, 1>} : memref<32x64xf32, #tpu.memory_space<vmem>>, vector<8x64xf32>
    %252 = arith.maximumf %250, %251 : vector<8x64xf32>
    %253 = vector.extract_strided_slice %252 {offsets = [0, 0], sizes = [8, 16], strides = [1, 1]} : vector<8x64xf32> to vector<8x16xf32>
    %254 = arith.truncf %253 : vector<8x16xf32> to vector<8x16xbf16>
    %c448_153 = arith.constant 448 : index
    %c0_154 = arith.constant 0 : index
    %255 = vector.load %arg2[%c448_153, %c0_154] : memref<1232x128xbf16, #tpu.memory_space<vmem>>, vector<16x32xbf16>
    %cst_155 = arith.constant dense<0.000000e+00> : vector<8x32xf32>
    %256 = tpu.matmul %254, %255, %cst_155 {dimension_numbers = #tpu.dot_dimension_numbers<[1], [0], [0], [1], [0, 0, 1, 1], [], []>} : vector<8x16xbf16>, vector<16x32xbf16>, vector<8x32xf32> -> vector<8x32xf32>
    %c432_156 = arith.constant 432 : index
    %c0_157 = arith.constant 0 : index
    %257 = vector.load %arg2[%c432_156, %c0_157] : memref<1232x128xbf16, #tpu.memory_space<vmem>>, vector<16x32xbf16>
    %cst_158 = arith.constant dense<0.000000e+00> : vector<8x32xf32>
    %258 = tpu.matmul %254, %257, %cst_158 {dimension_numbers = #tpu.dot_dimension_numbers<[1], [0], [0], [1], [0, 0, 1, 1], [], []>} : vector<8x16xbf16>, vector<16x32xbf16>, vector<8x32xf32> -> vector<8x32xf32>
    %c464_159 = arith.constant 464 : index
    %c0_160 = arith.constant 0 : index
    %259 = vector.load %arg2[%c464_159, %c0_160] : memref<1232x128xbf16, #tpu.memory_space<vmem>>, vector<16x32xbf16>
    %cst_161 = arith.constant dense<0.000000e+00> : vector<8x32xf32>
    %260 = tpu.matmul %254, %259, %cst_161 {dimension_numbers = #tpu.dot_dimension_numbers<[1], [0], [0], [1], [0, 0, 1, 1], [], []>} : vector<8x16xbf16>, vector<16x32xbf16>, vector<8x32xf32> -> vector<8x32xf32>
    %c704 = arith.constant 704 : index
    %c0_162 = arith.constant 0 : index
    %261 = vector.load %arg3[%c704, %c0_162] : memref<736x64xf32, #tpu.memory_space<vmem>>, vector<8x32xf32>
    %262 = vector.extract_strided_slice %258 {offsets = [7, 0], sizes = [1, 32], strides = [1, 1]} : vector<8x32xf32> to vector<1x32xf32>
    %263 = vector.extract_strided_slice %258 {offsets = [0, 0], sizes = [7, 32], strides = [1, 1]} : vector<8x32xf32> to vector<7x32xf32>
    %264 = tpu.concatenate %262, %263 in 0 : vector<1x32xf32>, vector<7x32xf32> -> vector<8x32xf32>
    %265 = arith.mulf %261, %264 : vector<8x32xf32>
    %266 = arith.addf %256, %265 : vector<8x32xf32>
    %c712 = arith.constant 712 : index
    %c0_163 = arith.constant 0 : index
    %267 = vector.load %arg3[%c712, %c0_163] : memref<736x64xf32, #tpu.memory_space<vmem>>, vector<8x32xf32>
    %268 = vector.extract_strided_slice %260 {offsets = [1, 0], sizes = [7, 32], strides = [1, 1]} : vector<8x32xf32> to vector<7x32xf32>
    %269 = vector.extract_strided_slice %260 {offsets = [0, 0], sizes = [1, 32], strides = [1, 1]} : vector<8x32xf32> to vector<1x32xf32>
    %270 = tpu.concatenate %268, %269 in 0 : vector<7x32xf32>, vector<1x32xf32> -> vector<8x32xf32>
    %271 = arith.mulf %267, %270 : vector<8x32xf32>
    %272 = arith.addf %266, %271 : vector<8x32xf32>
    %c544 = arith.constant 544 : index
    %c0_164 = arith.constant 0 : index
    %273 = vector.load %arg3[%c544, %c0_164] : memref<736x64xf32, #tpu.memory_space<vmem>>, vector<8x32xf32>
    %274 = arith.mulf %272, %273 : vector<8x32xf32>
    %c552 = arith.constant 552 : index
    %c0_165 = arith.constant 0 : index
    %275 = vector.load %arg3[%c552, %c0_165] : memref<736x64xf32, #tpu.memory_space<vmem>>, vector<8x32xf32>
    %276 = arith.addf %274, %275 : vector<8x32xf32>
    %cst_166 = arith.constant 2.000000e-01 : f32
    %277 = vector.broadcast %cst_166 : f32 to vector<8x32xf32>
    %278 = arith.mulf %277, %276 : vector<8x32xf32>
    %279 = arith.maximumf %276, %278 : vector<8x32xf32>
    %280 = arith.truncf %279 : vector<8x32xf32> to vector<8x32xbf16>
    %c512_167 = arith.constant 512 : index
    %c0_168 = arith.constant 0 : index
    %281 = vector.load %arg2[%c512_167, %c0_168] : memref<1232x128xbf16, #tpu.memory_space<vmem>>, vector<32x32xbf16>
    %cst_169 = arith.constant dense<0.000000e+00> : vector<8x32xf32>
    %282 = tpu.matmul %280, %281, %cst_169 {dimension_numbers = #tpu.dot_dimension_numbers<[1], [0], [0], [1], [0, 0, 1, 1], [], []>} : vector<8x32xbf16>, vector<32x32xbf16>, vector<8x32xf32> -> vector<8x32xf32>
    %c480_170 = arith.constant 480 : index
    %c0_171 = arith.constant 0 : index
    %283 = vector.load %arg2[%c480_170, %c0_171] : memref<1232x128xbf16, #tpu.memory_space<vmem>>, vector<32x32xbf16>
    %cst_172 = arith.constant dense<0.000000e+00> : vector<8x32xf32>
    %284 = tpu.matmul %280, %283, %cst_172 {dimension_numbers = #tpu.dot_dimension_numbers<[1], [0], [0], [1], [0, 0, 1, 1], [], []>} : vector<8x32xbf16>, vector<32x32xbf16>, vector<8x32xf32> -> vector<8x32xf32>
    %c544_173 = arith.constant 544 : index
    %c0_174 = arith.constant 0 : index
    %285 = vector.load %arg2[%c544_173, %c0_174] : memref<1232x128xbf16, #tpu.memory_space<vmem>>, vector<32x32xbf16>
    %cst_175 = arith.constant dense<0.000000e+00> : vector<8x32xf32>
    %286 = tpu.matmul %280, %285, %cst_175 {dimension_numbers = #tpu.dot_dimension_numbers<[1], [0], [0], [1], [0, 0, 1, 1], [], []>} : vector<8x32xbf16>, vector<32x32xbf16>, vector<8x32xf32> -> vector<8x32xf32>
    %c704_176 = arith.constant 704 : index
    %c0_177 = arith.constant 0 : index
    %287 = vector.load %arg3[%c704_176, %c0_177] : memref<736x64xf32, #tpu.memory_space<vmem>>, vector<8x32xf32>
    %288 = vector.extract_strided_slice %284 {offsets = [7, 0], sizes = [1, 32], strides = [1, 1]} : vector<8x32xf32> to vector<1x32xf32>
    %289 = vector.extract_strided_slice %284 {offsets = [0, 0], sizes = [7, 32], strides = [1, 1]} : vector<8x32xf32> to vector<7x32xf32>
    %290 = tpu.concatenate %288, %289 in 0 : vector<1x32xf32>, vector<7x32xf32> -> vector<8x32xf32>
    %291 = arith.mulf %287, %290 : vector<8x32xf32>
    %292 = arith.addf %282, %291 : vector<8x32xf32>
    %c712_178 = arith.constant 712 : index
    %c0_179 = arith.constant 0 : index
    %293 = vector.load %arg3[%c712_178, %c0_179] : memref<736x64xf32, #tpu.memory_space<vmem>>, vector<8x32xf32>
    %294 = vector.extract_strided_slice %286 {offsets = [1, 0], sizes = [7, 32], strides = [1, 1]} : vector<8x32xf32> to vector<7x32xf32>
    %295 = vector.extract_strided_slice %286 {offsets = [0, 0], sizes = [1, 32], strides = [1, 1]} : vector<8x32xf32> to vector<1x32xf32>
    %296 = tpu.concatenate %294, %295 in 0 : vector<7x32xf32>, vector<1x32xf32> -> vector<8x32xf32>
    %297 = arith.mulf %293, %296 : vector<8x32xf32>
    %298 = arith.addf %292, %297 : vector<8x32xf32>
    %c560 = arith.constant 560 : index
    %c0_180 = arith.constant 0 : index
    %299 = vector.load %arg3[%c560, %c0_180] : memref<736x64xf32, #tpu.memory_space<vmem>>, vector<8x32xf32>
    %300 = arith.mulf %298, %299 : vector<8x32xf32>
    %c568 = arith.constant 568 : index
    %c0_181 = arith.constant 0 : index
    %301 = vector.load %arg3[%c568, %c0_181] : memref<736x64xf32, #tpu.memory_space<vmem>>, vector<8x32xf32>
    %302 = arith.addf %300, %301 : vector<8x32xf32>
    %cst_182 = arith.constant 2.000000e-01 : f32
    %303 = vector.broadcast %cst_182 : f32 to vector<8x32xf32>
    %304 = arith.mulf %303, %302 : vector<8x32xf32>
    %305 = arith.maximumf %302, %304 : vector<8x32xf32>
    %c0_183 = arith.constant 0 : index
    %c0_184 = arith.constant 0 : index
    %306 = vector.load %arg6[%c0_183, %c0_184] : memref<32x64xf32, #tpu.memory_space<vmem>>, vector<8x32xf32>
    tpu.vector_store %arg6[%c0_183, %c0_184], %305 {strides = array<i32>} : memref<32x64xf32, #tpu.memory_space<vmem>>, vector<8x32xf32>,
    %c0_185 = arith.constant 0 : index
    %c0_186 = arith.constant 0 : index
    %307 = tpu.strided_load %arg6[%c0_185, %c0_186] {strides = array<i32: 2, 1>} : memref<32x64xf32, #tpu.memory_space<vmem>>, vector<4x64xf32>
    %c1_187 = arith.constant 1 : index
    %c0_188 = arith.constant 0 : index
    %308 = tpu.strided_load %arg6[%c1_187, %c0_188] {strides = array<i32: 2, 1>} : memref<32x64xf32, #tpu.memory_space<vmem>>, vector<4x64xf32>
    %309 = arith.maximumf %307, %308 : vector<4x64xf32>
    %310 = vector.extract_strided_slice %309 {offsets = [0, 0], sizes = [4, 32], strides = [1, 1]} : vector<4x64xf32> to vector<4x32xf32>
    %311 = arith.truncf %310 : vector<4x32xf32> to vector<4x32xbf16>
    %c608_189 = arith.constant 608 : index
    %c0_190 = arith.constant 0 : index
    %312 = vector.load %arg2[%c608_189, %c0_190] : memref<1232x128xbf16, #tpu.memory_space<vmem>>, vector<32x64xbf16>
    %cst_191 = arith.constant dense<0.000000e+00> : vector<4x64xf32>
    %313 = tpu.matmul %311, %312, %cst_191 {dimension_numbers = #tpu.dot_dimension_numbers<[1], [0], [0], [1], [0, 0, 1, 1], [], []>} : vector<4x32xbf16>, vector<32x64xbf16>, vector<4x64xf32> -> vector<4x64xf32>
    %c576 = arith.constant 576 : index
    %c0_192 = arith.constant 0 : index
    %314 = vector.load %arg2[%c576, %c0_192] : memref<1232x128xbf16, #tpu.memory_space<vmem>>, vector<32x64xbf16>
    %cst_193 = arith.constant dense<0.000000e+00> : vector<4x64xf32>
    %315 = tpu.matmul %311, %314, %cst_193 {dimension_numbers = #tpu.dot_dimension_numbers<[1], [0], [0], [1], [0, 0, 1, 1], [], []>} : vector<4x32xbf16>, vector<32x64xbf16>, vector<4x64xf32> -> vector<4x64xf32>
    %c640_194 = arith.constant 640 : index
    %c0_195 = arith.constant 0 : index
    %316 = vector.load %arg2[%c640_194, %c0_195] : memref<1232x128xbf16, #tpu.memory_space<vmem>>, vector<32x64xbf16>
    %cst_196 = arith.constant dense<0.000000e+00> : vector<4x64xf32>
    %317 = tpu.matmul %311, %316, %cst_196 {dimension_numbers = #tpu.dot_dimension_numbers<[1], [0], [0], [1], [0, 0, 1, 1], [], []>} : vector<4x32xbf16>, vector<32x64xbf16>, vector<4x64xf32> -> vector<4x64xf32>
    %c720 = arith.constant 720 : index
    %c0_197 = arith.constant 0 : index
    %318 = vector.load %arg3[%c720, %c0_197] : memref<736x64xf32, #tpu.memory_space<vmem>>, vector<4x64xf32>
    %319 = vector.extract_strided_slice %315 {offsets = [3, 0], sizes = [1, 64], strides = [1, 1]} : vector<4x64xf32> to vector<1x64xf32>
    %320 = vector.extract_strided_slice %315 {offsets = [0, 0], sizes = [3, 64], strides = [1, 1]} : vector<4x64xf32> to vector<3x64xf32>
    %321 = tpu.concatenate %319, %320 in 0 : vector<1x64xf32>, vector<3x64xf32> -> vector<4x64xf32>
    %322 = arith.mulf %318, %321 : vector<4x64xf32>
    %323 = arith.addf %313, %322 : vector<4x64xf32>
    %c728 = arith.constant 728 : index
    %c0_198 = arith.constant 0 : index
    %324 = vector.load %arg3[%c728, %c0_198] : memref<736x64xf32, #tpu.memory_space<vmem>>, vector<4x64xf32>
    %325 = vector.extract_strided_slice %317 {offsets = [1, 0], sizes = [3, 64], strides = [1, 1]} : vector<4x64xf32> to vector<3x64xf32>
    %326 = vector.extract_strided_slice %317 {offsets = [0, 0], sizes = [1, 64], strides = [1, 1]} : vector<4x64xf32> to vector<1x64xf32>
    %327 = tpu.concatenate %325, %326 in 0 : vector<3x64xf32>, vector<1x64xf32> -> vector<4x64xf32>
    %328 = arith.mulf %324, %327 : vector<4x64xf32>
    %329 = arith.addf %323, %328 : vector<4x64xf32>
    %c576_199 = arith.constant 576 : index
    %c0_200 = arith.constant 0 : index
    %330 = vector.load %arg3[%c576_199, %c0_200] : memref<736x64xf32, #tpu.memory_space<vmem>>, vector<4x64xf32>
    %331 = arith.mulf %329, %330 : vector<4x64xf32>
    %c584 = arith.constant 584 : index
    %c0_201 = arith.constant 0 : index
    %332 = vector.load %arg3[%c584, %c0_201] : memref<736x64xf32, #tpu.memory_space<vmem>>, vector<4x64xf32>
    %333 = arith.addf %331, %332 : vector<4x64xf32>
    %cst_202 = arith.constant 2.000000e-01 : f32
    %334 = vector.broadcast %cst_202 : f32 to vector<4x64xf32>
    %335 = arith.mulf %334, %333 : vector<4x64xf32>
    %336 = arith.maximumf %333, %335 : vector<4x64xf32>
    %337 = arith.truncf %336 : vector<4x64xf32> to vector<4x64xbf16>
    %c736 = arith.constant 736 : index
    %c0_203 = arith.constant 0 : index
    %338 = vector.load %arg2[%c736, %c0_203] : memref<1232x128xbf16, #tpu.memory_space<vmem>>, vector<64x64xbf16>
    %cst_204 = arith.constant dense<0.000000e+00> : vector<4x64xf32>
    %339 = tpu.matmul %337, %338, %cst_204 {dimension_numbers = #tpu.dot_dimension_numbers<[1], [0], [0], [1], [0, 0, 1, 1], [], []>} : vector<4x64xbf16>, vector<64x64xbf16>, vector<4x64xf32> -> vector<4x64xf32>
    %c672_205 = arith.constant 672 : index
    %c0_206 = arith.constant 0 : index
    %340 = vector.load %arg2[%c672_205, %c0_206] : memref<1232x128xbf16, #tpu.memory_space<vmem>>, vector<64x64xbf16>
    %cst_207 = arith.constant dense<0.000000e+00> : vector<4x64xf32>
    %341 = tpu.matmul %337, %340, %cst_207 {dimension_numbers = #tpu.dot_dimension_numbers<[1], [0], [0], [1], [0, 0, 1, 1], [], []>} : vector<4x64xbf16>, vector<64x64xbf16>, vector<4x64xf32> -> vector<4x64xf32>
    %c800 = arith.constant 800 : index
    %c0_208 = arith.constant 0 : index
    %342 = vector.load %arg2[%c800, %c0_208] : memref<1232x128xbf16, #tpu.memory_space<vmem>>, vector<64x64xbf16>
    %cst_209 = arith.constant dense<0.000000e+00> : vector<4x64xf32>
    %343 = tpu.matmul %337, %342, %cst_209 {dimension_numbers = #tpu.dot_dimension_numbers<[1], [0], [0], [1], [0, 0, 1, 1], [], []>} : vector<4x64xbf16>, vector<64x64xbf16>, vector<4x64xf32> -> vector<4x64xf32>
    %c720_210 = arith.constant 720 : index
    %c0_211 = arith.constant 0 : index
    %344 = vector.load %arg3[%c720_210, %c0_211] : memref<736x64xf32, #tpu.memory_space<vmem>>, vector<4x64xf32>
    %345 = vector.extract_strided_slice %341 {offsets = [3, 0], sizes = [1, 64], strides = [1, 1]} : vector<4x64xf32> to vector<1x64xf32>
    %346 = vector.extract_strided_slice %341 {offsets = [0, 0], sizes = [3, 64], strides = [1, 1]} : vector<4x64xf32> to vector<3x64xf32>
    %347 = tpu.concatenate %345, %346 in 0 : vector<1x64xf32>, vector<3x64xf32> -> vector<4x64xf32>
    %348 = arith.mulf %344, %347 : vector<4x64xf32>
    %349 = arith.addf %339, %348 : vector<4x64xf32>
    %c728_212 = arith.constant 728 : index
    %c0_213 = arith.constant 0 : index
    %350 = vector.load %arg3[%c728_212, %c0_213] : memref<736x64xf32, #tpu.memory_space<vmem>>, vector<4x64xf32>
    %351 = vector.extract_strided_slice %343 {offsets = [1, 0], sizes = [3, 64], strides = [1, 1]} : vector<4x64xf32> to vector<3x64xf32>
    %352 = vector.extract_strided_slice %343 {offsets = [0, 0], sizes = [1, 64], strides = [1, 1]} : vector<4x64xf32> to vector<1x64xf32>
    %353 = tpu.concatenate %351, %352 in 0 : vector<3x64xf32>, vector<1x64xf32> -> vector<4x64xf32>
    %354 = arith.mulf %350, %353 : vector<4x64xf32>
    %355 = arith.addf %349, %354 : vector<4x64xf32>
    %c592 = arith.constant 592 : index
    %c0_214 = arith.constant 0 : index
    %356 = vector.load %arg3[%c592, %c0_214] : memref<736x64xf32, #tpu.memory_space<vmem>>, vector<4x64xf32>
    %357 = arith.mulf %355, %356 : vector<4x64xf32>
    %c600 = arith.constant 600 : index
    %c0_215 = arith.constant 0 : index
    %358 = vector.load %arg3[%c600, %c0_215] : memref<736x64xf32, #tpu.memory_space<vmem>>, vector<4x64xf32>
    %359 = arith.addf %357, %358 : vector<4x64xf32>
    %cst_216 = arith.constant 2.000000e-01 : f32
    %360 = vector.broadcast %cst_216 : f32 to vector<4x64xf32>
    %361 = arith.mulf %360, %359 : vector<4x64xf32>
    %362 = arith.maximumf %359, %361 : vector<4x64xf32>
    %c0_217 = arith.constant 0 : index
    %c0_218 = arith.constant 0 : index
    %363 = vector.load %arg6[%c0_217, %c0_218] : memref<32x64xf32, #tpu.memory_space<vmem>>, vector<4x64xf32>
    tpu.vector_store %arg6[%c0_217, %c0_218], %362 {strides = array<i32>} : memref<32x64xf32, #tpu.memory_space<vmem>>, vector<4x64xf32>,
    %c0_219 = arith.constant 0 : index
    %c0_220 = arith.constant 0 : index
    %364 = tpu.strided_load %arg6[%c0_219, %c0_220] {strides = array<i32: 2, 1>} : memref<32x64xf32, #tpu.memory_space<vmem>>, vector<2x64xf32>
    %c1_221 = arith.constant 1 : index
    %c0_222 = arith.constant 0 : index
    %365 = tpu.strided_load %arg6[%c1_221, %c0_222] {strides = array<i32: 2, 1>} : memref<32x64xf32, #tpu.memory_space<vmem>>, vector<2x64xf32>
    %366 = arith.maximumf %364, %365 : vector<2x64xf32>
    %367 = arith.truncf %366 : vector<2x64xf32> to vector<2x64xbf16>
    %c912 = arith.constant 912 : index
    %c0_223 = arith.constant 0 : index
    %368 = vector.load %arg2[%c912, %c0_223] : memref<1232x128xbf16, #tpu.memory_space<vmem>>, vector<64x128xbf16>
    %cst_224 = arith.constant dense<0.000000e+00> : vector<2x128xf32>
    %369 = tpu.matmul %367, %368, %cst_224 {dimension_numbers = #tpu.dot_dimension_numbers<[1], [0], [0], [1], [0, 0, 1, 1], [], []>} : vector<2x64xbf16>, vector<64x128xbf16>, vector<2x128xf32> -> vector<2x128xf32>
    %c0_225 = arith.constant 0 : index
    %c0_226 = arith.constant 0 : index
    %370 = vector.load %arg4[%c0_225, %c0_226] : memref<8x128xf32, #tpu.memory_space<vmem>>, vector<1x128xf32>
    %371 = vector.broadcast %370 : vector<1x128xf32> to vector<2x128xf32>
    %372 = arith.addf %369, %371 : vector<2x128xf32>
    %c1_227 = arith.constant 1 : index
    %c0_228 = arith.constant 0 : index
    %373 = vector.load %arg4[%c1_227, %c0_228] : memref<8x128xf32, #tpu.memory_space<vmem>>, vector<1x128xf32>
    %374 = vector.broadcast %373 : vector<1x128xf32> to vector<2x128xf32>
    %375 = arith.mulf %372, %374 : vector<2x128xf32>
    %c2 = arith.constant 2 : index
    %c0_229 = arith.constant 0 : index
    %376 = vector.load %arg4[%c2, %c0_229] : memref<8x128xf32, #tpu.memory_space<vmem>>, vector<1x128xf32>
    %377 = vector.broadcast %376 : vector<1x128xf32> to vector<2x128xf32>
    %378 = arith.addf %375, %377 : vector<2x128xf32>
    %cst_230 = arith.constant 2.000000e-01 : f32
    %379 = vector.broadcast %cst_230 : f32 to vector<2x128xf32>
    %380 = arith.mulf %379, %378 : vector<2x128xf32>
    %381 = arith.maximumf %378, %380 : vector<2x128xf32>
    %382 = arith.truncf %381 : vector<2x128xf32> to vector<2x128xbf16>
    %c976 = arith.constant 976 : index
    %c0_231 = arith.constant 0 : index
    %383 = vector.load %arg2[%c976, %c0_231] : memref<1232x128xbf16, #tpu.memory_space<vmem>>, vector<128x128xbf16>
    %cst_232 = arith.constant dense<0.000000e+00> : vector<2x128xf32>
    %384 = tpu.matmul %382, %383, %cst_232 {dimension_numbers = #tpu.dot_dimension_numbers<[1], [0], [0], [1], [0, 0, 1, 1], [], []>} : vector<2x128xbf16>, vector<128x128xbf16>, vector<2x128xf32> -> vector<2x128xf32>
    %c3 = arith.constant 3 : index
    %c0_233 = arith.constant 0 : index
    %385 = vector.load %arg4[%c3, %c0_233] : memref<8x128xf32, #tpu.memory_space<vmem>>, vector<1x128xf32>
    %386 = vector.broadcast %385 : vector<1x128xf32> to vector<2x128xf32>
    %387 = arith.addf %384, %386 : vector<2x128xf32>
    %c4 = arith.constant 4 : index
    %c0_234 = arith.constant 0 : index
    %388 = vector.load %arg4[%c4, %c0_234] : memref<8x128xf32, #tpu.memory_space<vmem>>, vector<1x128xf32>
    %389 = vector.broadcast %388 : vector<1x128xf32> to vector<2x128xf32>
    %390 = arith.mulf %387, %389 : vector<2x128xf32>
    %c5 = arith.constant 5 : index
    %c0_235 = arith.constant 0 : index
    %391 = vector.load %arg4[%c5, %c0_235] : memref<8x128xf32, #tpu.memory_space<vmem>>, vector<1x128xf32>
    %392 = vector.broadcast %391 : vector<1x128xf32> to vector<2x128xf32>
    %393 = arith.addf %390, %392 : vector<2x128xf32>
    %cst_236 = arith.constant 2.000000e-01 : f32
    %394 = vector.broadcast %cst_236 : f32 to vector<2x128xf32>
    %395 = arith.mulf %394, %393 : vector<2x128xf32>
    %396 = arith.maximumf %393, %395 : vector<2x128xf32>
    %397 = arith.truncf %396 : vector<2x128xf32> to vector<2x128xbf16>
    %c1104 = arith.constant 1104 : index
    %c0_237 = arith.constant 0 : index
    %398 = vector.load %arg2[%c1104, %c0_237] : memref<1232x128xbf16, #tpu.memory_space<vmem>>, vector<128x5xbf16>
    %cst_238 = arith.constant dense<0.000000e+00> : vector<2x5xf32>
    %399 = tpu.matmul %397, %398, %cst_238 {dimension_numbers = #tpu.dot_dimension_numbers<[1], [0], [0], [1], [0, 0, 1, 1], [], []>} : vector<2x128xbf16>, vector<128x5xbf16>, vector<2x5xf32> -> vector<2x5xf32>
    %c6 = arith.constant 6 : index
    %c0_239 = arith.constant 0 : index
    %400 = vector.load %arg4[%c6, %c0_239] : memref<8x128xf32, #tpu.memory_space<vmem>>, vector<1x5xf32>
    %401 = vector.broadcast %400 : vector<1x5xf32> to vector<2x5xf32>
    %402 = arith.addf %399, %401 : vector<2x5xf32>
    %c0_240 = arith.constant 0 : index
    %c0_241 = arith.constant 0 : index
    %403 = vector.load %arg5[%c0_240, %c0_241] : memref<2x5xf32, #tpu.memory_space<vmem>>, vector<2x5xf32>
    tpu.vector_store %arg5[%c0_240, %c0_241], %402 {strides = array<i32>} : memref<2x5xf32, #tpu.memory_space<vmem>>, vector<2x5xf32>,
    return
  }
}

</mosaic_0001>

<bundles_post_ra>
// kernel: forward.1
= control target key start
LH: loop header
LB: loop body
LE: loop exit
PB: predicated region body
PF: predicated region fallthrough
CT: control target
= control target key end

     0   :  { %10 = vsyncpa [#allocation4], 0  ;;  %s2803_s0 = inlined_call_operand.vmem [shape: f32[32,6], index: 0, kind: input, shape index: {}]   ;;  %s2804_s1 = inlined_call_operand.vmem [shape: f32[32,12], index: 1, kind: input, shape index: {}]   ;;  %s2805_s2 = inlined_call_operand.hbm [shape: bf16[1232,128], index: 2, kind: input, shape index: {}]   ;;  %s2806_s3 = inlined_call_operand.hbm [shape: f32[736,64], index: 3, kind: input, shape index: {}]   ;;  %s2807_s4 = inlined_call_operand.vmem [shape: f32[8,128], index: 4, kind: input, shape index: {}]   ;;  %s2808_s5 = inlined_call_operand.hbm [shape: f32[2,5], index: 5, kind: output, shape index: {}]  }
   0x1   :  { %11 = vsyncpa [#allocation7], 0 }
   0x2   :  { %12 = vsyncpa [#allocation5], 0  ;;  %s21_s20 = sshll.u32 %s2805_s2, 4  ;;  %s2478_s21 = smov [#allocation3]   ;;  %s22_s20 = int_to_ptr.hbm [resolvable:$true] %s21_s20 }
   0x3   :  { %s23_s22 = sshll.u32 %s2478_s21, 4  ;;  %s34_s25 = sshll.u32 %s2806_s3, 4  ;;  %s24_s22 = int_to_ptr.vmem [resolvable:$true] %s23_s22  ;;  %s35_s25 = int_to_ptr.hbm [resolvable:$true] %s34_s25 }
   0x4   :  { %s2479_s26 = smov 64   ;;  %s2480_s27 = smov 4  }
   0x5   :  { %29 = dma.hbm_to_vmem [thread:$0]  %s22_s20, 9856, %s24_s22, [#allocation4], %s2479_s26, %s2479_s26, %s2480_s27  }
   0x6   :  { %s2481_s28 = smov [#allocation6]   ;;  %s2482_s30 = smov 128  }
   0x7   :  { %s36_s29 = sshll.u32 %s2481_s28, 4  ;;  %s2483_s6 = smov 8   ;;  %s37_s29 = int_to_ptr.vmem [resolvable:$true] %s36_s29 }
   0x8   :  { %42 = dma.hbm_to_vmem [thread:$0]  %s35_s25, 11776, %s37_s29, [#allocation7], %s2482_s30, %s2482_s30, %s2483_s6  }
   0x9   :  { %2472 = dma.done.wait [#allocation4], 9856  }
   0xa   :  { %2473 = vsyncadd [#allocation4], 4294957440 }
   0xb   :  { %2474 = dma.done.wait [#allocation7], 11776  }
   0xc   :  { %2475 = vsyncadd [#allocation7], 4294955520  ;;  %vm143_vm0 = vcmask 1042432   ;;  %v135_v0 = vld [vmem:[#allocation3] sm:$0x7]  ;;  %v65_v1 = vld [vmem:[%s2804_s1 + $0x10] sm:$0xff] }
   0xd   :  { %v66_v2 = vld [vmem:[%s2804_s1 + $0x18] sm:$0xff]  ;;  %v145_v3 = vsel %vm143_vm0, %v135_v0, 0  ;;  %v59_v5 = vld [vmem:[%s2803_s0] sm:$0xff]  ;;  %v60_v6 = vld [vmem:[%s2803_s0 + $0x8] sm:$0xff]  ;;  %vm136_vm1 = vcmask 48128   ;;  %vm83_vm2 = vcmask 261120  }
   0xe   :  { %v68_v4 = vpack.c.bf16 %v66_v2, %v65_v1  ;;  %v63_v7 = vld [vmem:[%s2804_s1] sm:$0xff]  ;;  %154 = vmatpush.bf16.msra.mxu2 %v145_v3  ;;  %v133_v8 = vpack.c.bf16 %v60_v6, %v59_v5  ;;  %v64_v9 = vld [vmem:[%s2804_s1 + $0x8] sm:$0xff]  ;;  %v2319_v11 = vld [vmem:[#allocation3 + $0x1b0] sm:$0xff]  ;;  %vm446_vm3 = vcmask 1045504   ;;  %vm439_vm4 = vcmask 97280   ;;  %s2485_s7 = smov [#allocation8]  }
   0xf   :  { %v67_v10 = vpack.c.bf16 %v64_v9, %v63_v7  ;;  %v2320_v12 = vld [vmem:[#allocation3 + $0x1b8] sm:$0xff]  ;;  %v61_v13 = vld [vmem:[%s2803_s0 + $0x10] sm:$0xff]  ;;  %v2321_v16 = vld [vmem:[#allocation3 + $0x1c0] sm:$0xff]  ;;  %vm202_vm5 = vcmask 130048   ;;  %vm370_vm6 = vcmask 1043456   ;;  %vm265_vm7 = vcmask 1040384  }
  0x10   :  { %96 = vmatpush.bf16.msra.mxu0 %v68_v4  ;;  %2383 = vmatpush.bf16.msra.mxu1 %v68_v4  ;;  %v62_v14 = vld [vmem:[%s2803_s0 + $0x18] sm:$0xff]  ;;  %v2049_v17 = vld [vmem:[#allocation3 + $0x28] sm:$0xf]  ;;  %v2325_v18 = vld [vmem:[#allocation3 + $0x28] sm:$0x30]  ;;  %vm314_vm8 = vcmask 1046528  }
  0x11   :  { %2025 = vmatmul.msk.bf16.vlgmr.msra.gmra.mxu2 %vm136_vm1, %v133_v8  ;;  %v134_v15 = vpack.c.bf16 %v62_v14, %v61_v13  ;;  %v2050_v19 = vor.u32 %v2325_v18, %v2049_v17  ;;  %v2322_v21 = vld [vmem:[#allocation3 + $0x10] sm:$0xff]  ;;  %v2323_v22 = vld [vmem:[#allocation3 + $0x8] sm:$0xff]  ;;  %v2324_v23 = vld [vmem:[#allocation3 + $0x18] sm:$0xff]  ;;  %vm363_vm9 = vcmask 64512   ;;  %vm54_vm10 = vcmask 523264   ;;  %s1997_s3 = sshll.u32 %s2485_s7, 4  ;;  %s1998_s3 = int_to_ptr.vmem [resolvable:$true] %s1997_s3 }
  0x12   :  { %294 = vmatpush.bf16.msrb.mxu2 %v2322_v21  ;;  %216 = vmatpush.bf16.msra.mxu3 %v2323_v22  ;;  %v166_v26 = vld [vmem:[#allocation6] sm:$0xff]  ;;  %v167_v29 = vld [vmem:[#allocation6 + $0x8] sm:$0xff]  ;;  %v168_v43 = vld [vmem:[#allocation6 + $0x10] sm:$0xff]  ;;  %vm1758_vm11 = vcmask 519168   ;;  %s1999_s10 = sshll.u32 %s2808_s5, 4  ;;  %vm1990_vm12 = vcmask 33792   ;;  %s2000_s10 = int_to_ptr.hbm [resolvable:$true] %s1999_s10 }
  0x13   :  { %v448_v20 = vsel %vm446_vm3, %v2050_v19, 0  ;;  %v174_v28 = vld [vmem:[#allocation6 + $0x20] sm:$0xff]  ;;  %v175_v34 = vld [vmem:[#allocation6 + $0x28] sm:$0xff]  ;;  %v176_v47 = vld [vmem:[#allocation6 + $0x30] sm:$0xff] }
  0x14   :  { %97 = vmatpush.bf16.msra.mxu0 %v67_v10  ;;  %2384 = vmatpush.bf16.msra.mxu1 %v67_v10  ;;  %v169_v49 = vld [vmem:[#allocation6 + $0x18] sm:$0xff]  ;;  %v2075_v60 = vld [vmem:[#allocation3 + $0x50] sm:$0xf]  ;;  %v2329_v61 = vld [vmem:[#allocation3 + $0x50] sm:$0x30] }
  0x15   :  { %v177_v52 = vld [vmem:[#allocation6 + $0x38] sm:$0xff]  ;;  %v2076_v62 = vor.u32 %v2329_v61, %v2075_v60  ;;  %v2327_v0 = vld [vmem:[#allocation3 + $0x30] sm:$0xff]  ;;  %v469_v2 = vld [vmem:[#allocation6 + $0xc0] sm:$0xff] }
  0x16   :  { %v2328_v3 = vld [vmem:[#allocation3 + $0x40] sm:$0xff]  ;;  %v477_v8 = vld [vmem:[#allocation6 + $0xe0] sm:$0xff]  ;;  %v478_v13 = vld [vmem:[#allocation6 + $0xe8] sm:$0xff] }
  0x17   :  { %2018 = vmatmul.msk.bf16.vlgmr.msra.gmra.mxu0 %vm83_vm2, %v2319_v11  ;;  %2019 = vmatmul.msk.bf16.vlgmr.msra.gmra.mxu1 %vm83_vm2, %v2320_v12  ;;  %v737_v63 = vsel %vm446_vm3, %v2076_v62, 0  ;;  %v362_v7 = vld [vmem:[#allocation3 + $0x20] sm:$0xf]  ;;  %v470_v11 = vld [vmem:[#allocation6 + $0xc8] sm:$0xff]  ;;  %v2590_v62 = vld [vmem:[#allocation6 + $0x260] sm:$0xff] }
  0x18   :  { %125 = vmatpush.bf16.msrb.mxu1 %v68_v4  ;;  %457 = vmatpush.bf16.msrb.mxu0 %v448_v20  ;;  %v372_v9 = vsel %vm370_vm6, %v362_v7, 0  ;;  %v471_v20 = vld [vmem:[#allocation6 + $0xd0] sm:$0xff]  ;;  %v337_v61 = vld [vmem:[#allocation6 + $0x48] sm:$0xff] }
  0x19   :  { %545 = vmatpush.bf16.msra.mxu2 %v2328_v3  ;;  %381 = vmatpush.bf16.msrb.mxu3 %v372_v9  ;;  %v2599_v9 = vld [vmem:[#allocation6 + $0x270] sm:$0xff] }
  0x1c   :  { %126 = vmatpush.bf16.msrb.mxu1 %v67_v10 }
  0x20   :  { %243 = vmatpush.bf16.msra.mxu1 %v2324_v23 }
  0x21   :  { %2026 = vmatmul.msk.bf16.gmra.mxu2 %vm136_vm1, %v134_v15 }
  0x27   :  { %2024 = vmatmul.msk.bf16.vlgmr.msrb.gmra.mxu1 %vm83_vm2, %v2321_v16 }
  0x28   :  { %518 = vmatpush.bf16.msrb.mxu1 %v2327_v0 }
  0x94   :  { %v99_v24 = vpop.f32.mrf.mxu0  ;;  %v156_v25 = vpop.f32.mrf.mxu2 }
  0x95   :  { %v170_v27 = vmul.f32 %v166_v26, %v156_v25  ;;  %v104_v36 = vpop.f32.mrf.mxu1 }
  0x97   :  { %v178_v30 = vadd.f32 %v174_v28, %v170_v27  ;;  %v479_v28 = vld [vmem:[#allocation6 + $0xf0] sm:$0xff] }
  0x99   :  { %v182_v37 = vmul.f32 0.2, %v178_v30 }
  0x9b   :  { %v186_v40 = vmax.f32 %v178_v30, %v182_v37  ;;  %v472_v30 = vld [vmem:[#allocation6 + $0xd8] sm:$0xff] }
  0x9c   :  { %v101_v31 = vpop.f32.mrf.mxu0  ;;  %v158_v33 = vpop.f32.mrf.mxu2 }
  0x9d   :  { %v430_v32 = vpack.c.bf16 %v101_v31, %v99_v24  ;;  %v171_v35 = vmul.f32 %v167_v29, %v158_v33  ;;  %v106_v46 = vpop.f32.mrf.mxu1 }
  0x9e   :  { %v431_v48 = vpack.c.bf16 %v106_v46, %v104_v36 }
  0x9f   :  { %2051 = vmatmul.msk.bf16.vlgmr.msrb.gmra.mxu0 %vm439_vm4, %v430_v32  ;;  %v179_v38 = vadd.f32 %v175_v34, %v171_v35  ;;  %v480_v34 = vld [vmem:[#allocation6 + $0xf8] sm:$0xff] }
  0xa1   :  { %v183_v39 = vmul.f32 0.2, %v179_v38 }
  0xa3   :  { %v187_v41 = vmax.f32 %v179_v38, %v183_v39 }
  0xa4   :  { %v161_v42 = vpop.f32.mrf.mxu2 }
  0xa5   :  { %v190_v44 = vpack.c.bf16 %v187_v41, %v186_v40  ;;  %v172_v45 = vmul.f32 %v168_v43, %v161_v42  ;;  %v2562_v1 = vpop.f32.mrf.mxu1  ;;  %v2326_v40 = vld [vmem:[#allocation3 + $0x38] sm:$0xff]  ;;  %v2575_v41 = vld [vmem:[#allocation6 + $0x268] sm:$0xff] }
  0xa7   :  { %2031 = vmatmul.msk.bf16.vlgmr.msra.gmra.mxu3 %vm202_vm5, %v190_v44  ;;  %2037 = vmatmul.msk.bf16.vlgmr.msra.gmra.mxu1 %vm202_vm5, %v190_v44  ;;  %v180_v50 = vadd.f32 %v176_v47, %v172_v45 }
  0xa8   :  { %2043 = vmatmul.msk.bf16.vlgmr.msrb.gmra.mxu2 %vm202_vm5, %v190_v44  ;;  %746 = vmatpush.bf16.msra.mxu1 %v737_v63 }
  0xa9   :  { %v184_v54 = vmul.f32 0.2, %v180_v50  ;;  %595 = vmatpush.bf16.msra.mxu3 %v2326_v40 }
  0xab   :  { %v188_v57 = vmax.f32 %v180_v50, %v184_v54 }
  0xac   :  { %v163_v51 = vpop.f32.mrf.mxu2 }
  0xad   :  { %v173_v53 = vmul.f32 %v169_v49, %v163_v51  ;;  %v2564_v4 = vpop.f32.mrf.mxu1  ;;  %v2579_v51 = vld [vmem:[#allocation6 + $0x288] sm:$0xff] }
  0xaf   :  { %2052 = vmatmul.msk.bf16.gmra.mxu0 %vm439_vm4, %v431_v48  ;;  %v181_v55 = vadd.f32 %v177_v52, %v173_v53 }
  0xb1   :  { %v185_v56 = vmul.f32 0.2, %v181_v55 }
  0xb3   :  { %v189_v58 = vmax.f32 %v181_v55, %v185_v56 }
  0xb5   :  { %v191_v59 = vpack.c.bf16 %v189_v58, %v188_v57 }
  0xb7   :  { %2032 = vmatmul.msk.bf16.gmra.mxu3 %vm202_vm5, %v191_v59  ;;  %2038 = vmatmul.msk.bf16.gmra.mxu1 %vm202_vm5, %v191_v59 }
  0xb8   :  { %2044 = vmatmul.msk.bf16.gmra.mxu2 %vm202_vm5, %v191_v59 }
 0x11c   :  { %v459_v5 = vpop.f32.mrf.mxu0 }
 0x11d   :  { %v473_v6 = vmul.f32 %v469_v2, %v459_v5  ;;  %v2592_v2 = vld [vmem:[#allocation6 + $0x280] sm:$0xff] }
 0x11f   :  { %v481_v10 = vadd.f32 %v477_v8, %v473_v6  ;;  %v2596_v6 = vld [vmem:[#allocation6 + $0x278] sm:$0xff] }
 0x121   :  { %v485_v14 = vmul.f32 0.2, %v481_v10 }
 0x123   :  { %v489_v18 = vmax.f32 %v481_v10, %v485_v14 }
 0x124   :  { %v461_v12 = vpop.f32.mrf.mxu0  ;;  %v2567_v16 = vpop.f32.mrf.mxu1 }
 0x125   :  { %v474_v15 = vmul.f32 %v470_v11, %v461_v12  ;;  %v315_v60 = vrot.slane %v2567_v16, 1 }
 0x127   :  { %v482_v17 = vadd.f32 %v478_v13, %v474_v15  ;;  %v345_v13 = vld [vmem:[#allocation6 + $0x68] sm:$0xff] }
 0x129   :  { %v486_v19 = vmul.f32 0.2, %v482_v17 }
 0x12a   :  { %v218_v22 = vpop.f32.mrf.mxu3 }
 0x12b   :  { %v490_v21 = vmax.f32 %v482_v17, %v486_v19  ;;  %v296_v27 = vpop.f32.mrf.mxu2  ;;  %v266_v38 = vrot.slane %v218_v22, 7 }
 0x12c   :  { %v464_v23 = vpop.f32.mrf.mxu0  ;;  %v247_v26 = vpop.f32.mrf.mxu1 }
 0x12d   :  { %v2569_v24 = vpack.c.bf16 %v490_v21, %v489_v18  ;;  %v475_v25 = vmul.f32 %v471_v20, %v464_v23  ;;  %v316_v47 = vrot.slane %v247_v26, 1  ;;  %v336_v18 = vld [vmem:[#allocation6 + $0x40] sm:$0xff]  ;;  %v2606_v21 = vld [vmem:[#allocation6 + $0x290] sm:$0xff]  ;;  %v2610_v26 = vld [vmem:[#allocation6 + $0x298] sm:$0xff] }
 0x12f   :  { %2057 = vmatmul.msk.bf16.vlgmr.msrb.gmra.mxu1 %vm202_vm5, %v2569_v24  ;;  %2063 = vmatmul.msk.bf16.vlgmr.msra.gmra.mxu2 %vm202_vm5, %v2569_v24  ;;  %v483_v29 = vadd.f32 %v479_v28, %v475_v25  ;;  %v317_v3 = vsel %vm314_vm8, %v315_v60, %v316_v47  ;;  %v344_v28 = vld [vmem:[#allocation6 + $0x60] sm:$0xff] }
 0x130   :  { %v328_v14 = vmul.f32 %v317_v3, %v2592_v2 }
 0x131   :  { %v487_v35 = vmul.f32 0.2, %v483_v29 }
 0x132   :  { %v220_v31 = vpop.f32.mrf.mxu3 }
 0x133   :  { %v267_v32 = vrot.slane %v220_v31, 7  ;;  %v298_v43 = vpop.f32.mrf.mxu2  ;;  %v491_v45 = vmax.f32 %v483_v29, %v487_v35 }
 0x134   :  { %v466_v33 = vpop.f32.mrf.mxu0  ;;  %v250_v37 = vpop.f32.mrf.mxu1 }
 0x135   :  { %v476_v36 = vmul.f32 %v472_v30, %v466_v33  ;;  %v268_v42 = vsel %vm265_vm7, %v266_v38, %v267_v32  ;;  %v318_v44 = vrot.slane %v250_v37, 1 }
 0x136   :  { %v278_v48 = vmul.f32 %v268_v42, %v2575_v41 }
 0x137   :  { %v484_v39 = vadd.f32 %v480_v34, %v476_v36  ;;  %v319_v52 = vsel %vm314_vm8, %v316_v47, %v318_v44 }
 0x138   :  { %v299_v54 = vadd.f32 %v298_v43, %v278_v48  ;;  %v329_v55 = vmul.f32 %v319_v52, %v2579_v51  ;;  %v338_v43 = vld [vmem:[#allocation6 + $0x50] sm:$0xff] }
 0x139   :  { %v488_v46 = vmul.f32 0.2, %v484_v39 }
 0x13a   :  { %v223_v50 = vpop.f32.mrf.mxu3  ;;  %v333_v57 = vadd.f32 %v329_v55, %v299_v54 }
 0x13b   :  { %v492_v49 = vmax.f32 %v484_v39, %v488_v46  ;;  %v301_v56 = vpop.f32.mrf.mxu2  ;;  %v269_v58 = vrot.slane %v223_v50, 7  ;;  %v346_v46 = vld [vmem:[#allocation6 + $0x70] sm:$0xff] }
 0x13c   :  { %v252_v0 = vpop.f32.mrf.mxu1  ;;  %v341_v8 = vmul.f32 %v337_v61, %v333_v57  ;;  %v2331_v61 = vld [vmem:[#allocation3 + $0x58] sm:$0xff] }
 0x13d   :  { %v2582_v53 = vpack.c.bf16 %v492_v49, %v491_v45  ;;  %v270_v10 = vsel %vm265_vm7, %v267_v32, %v269_v58  ;;  %v320_v12 = vrot.slane %v252_v0, 1  ;;  %786 = vmatpush.bf16.msrb.mxu2 %v2331_v61 }
 0x13e   :  { %v279_v17 = vmul.f32 %v270_v10, %v2599_v9  ;;  %v349_v20 = vadd.f32 %v345_v13, %v341_v8  ;;  %v753_v8 = vld [vmem:[#allocation6 + $0x180] sm:$0xff] }
 0x13f   :  { %2058 = vmatmul.msk.bf16.gmra.mxu1 %vm202_vm5, %v2582_v53  ;;  %2064 = vmatmul.msk.bf16.gmra.mxu2 %vm202_vm5, %v2582_v53  ;;  %v321_v22 = vsel %vm314_vm8, %v318_v44, %v320_v12  ;;  %v327_v23 = vsel %vm314_vm8, %v320_v12, %v315_v60  ;;  %v347_v44 = vld [vmem:[#allocation6 + $0x78] sm:$0xff]  ;;  %v754_v12 = vld [vmem:[#allocation6 + $0x188] sm:$0xff] }
 0x140   :  { %v302_v31 = vadd.f32 %v301_v56, %v279_v17  ;;  %v330_v32 = vmul.f32 %v321_v22, %v2606_v21  ;;  %v331_v33 = vmul.f32 %v327_v23, %v2610_v26  ;;  %v353_v35 = vmul.f32 0.2, %v349_v20  ;;  %v393_v22 = vld [vmem:[#allocation6 + $0x80] sm:$0xff] }
 0x142   :  { %v225_v59 = vpop.f32.mrf.mxu3  ;;  %v334_v39 = vadd.f32 %v330_v32, %v302_v31  ;;  %v357_v42 = vmax.f32 %v349_v20, %v353_v35 }
 0x143   :  { %v260_v63 = vrot.slane %v225_v59, 7  ;;  %v303_v25 = vpop.f32.mrf.mxu2 }
 0x144   :  { %v342_v45 = vmul.f32 %v338_v43, %v334_v39  ;;  %v911_v39 = vld [vmem:[#allocation3 + $0x78] sm:$0xf] }
 0x145   :  { %v276_v5 = vsel %vm265_vm7, %v260_v63, %v266_v38  ;;  %v271_v7 = vsel %vm265_vm7, %v269_v58, %v260_v63  ;;  %v339_v38 = vld [vmem:[#allocation6 + $0x58] sm:$0xff]  ;;  %v2332_v63 = vld [vmem:[#allocation3 + $0x68] sm:$0xff] }
 0x146   :  { %v277_v11 = vmul.f32 %v276_v5, %v2590_v62  ;;  %v280_v16 = vmul.f32 %v271_v7, %v2596_v6  ;;  %v350_v48 = vadd.f32 %v346_v46, %v342_v45  ;;  %v395_v45 = vld [vmem:[#allocation6 + $0x90] sm:$0xff] }
 0x148   :  { %v297_v15 = vadd.f32 %v296_v27, %v277_v11  ;;  %v725_v27 = vpack.c.bf16 %v2564_v4, %v2562_v1  ;;  %v304_v30 = vadd.f32 %v303_v25, %v280_v16  ;;  %v354_v50 = vmul.f32 0.2, %v350_v48  ;;  %v757_v11 = vld [vmem:[#allocation6 + $0x190] sm:$0xff]  ;;  %v758_v16 = vld [vmem:[#allocation6 + $0x198] sm:$0xff] }
 0x14a   :  { %v332_v19 = vadd.f32 %v328_v14, %v297_v15  ;;  %v335_v36 = vadd.f32 %v331_v33, %v304_v30  ;;  %v358_v54 = vmax.f32 %v350_v48, %v354_v50  ;;  %v662_v14 = vld [vmem:[#allocation3 + $0x48] sm:$0xf]  ;;  %v403_v48 = vld [vmem:[#allocation6 + $0xb0] sm:$0xff] }
 0x14b   :  { %v670_v17 = vsel %vm370_vm6, %v662_v14, 0 }
 0x14c   :  { %v340_v29 = vmul.f32 %v336_v18, %v332_v19  ;;  %v343_v1 = vmul.f32 %v339_v38, %v335_v36  ;;  %679 = vmatpush.bf16.msra.mxu0 %v670_v17 }
 0x14e   :  { %v348_v34 = vadd.f32 %v344_v28, %v340_v29  ;;  %v351_v47 = vadd.f32 %v347_v44, %v343_v1  ;;  %v401_v28 = vld [vmem:[#allocation6 + $0xa0] sm:$0xff] }
 0x14f   :  { %2077 = vmatmul.msk.bf16.vlgmr.msra.gmra.mxu1 %vm439_vm4, %v725_v27 }
 0x150   :  { %v352_v37 = vmul.f32 0.2, %v348_v34  ;;  %v355_v49 = vmul.f32 0.2, %v351_v47 }
 0x152   :  { %v356_v40 = vmax.f32 %v348_v34, %v352_v37  ;;  %v359_v52 = vmax.f32 %v351_v47, %v355_v49  ;;  %v394_v34 = vld [vmem:[#allocation6 + $0x88] sm:$0xff] }
 0x153   :  { %v402_v37 = vld [vmem:[#allocation6 + $0xa8] sm:$0xff] }
 0x154   :  { %v360_v4 = vpack.c.bf16 %v357_v42, %v356_v40  ;;  %v361_v55 = vpack.c.bf16 %v359_v52, %v358_v54  ;;  %v932_v40 = vld [vmem:[#allocation3 + $0x88] sm:$0xf]  ;;  %v916_v42 = vsel %vm370_vm6, %v911_v39, 0 }
 0x155   :  { %v934_v43 = vsel %vm370_vm6, %v932_v40, 0  ;;  %925 = vmatpush.bf16.msra.mxu2 %v916_v42 }
 0x156   :  { %2045 = vmatmul.msk.bf16.vlgmr.msrb.gmra.mxu3 %vm363_vm9, %v360_v4 }
 0x157   :  { %808 = vmatpush.bf16.msrb.mxu3 %v2332_v63 }
 0x166   :  { %2046 = vmatmul.msk.bf16.gmra.mxu3 %vm363_vm9, %v361_v55  ;;  %v396_v55 = vld [vmem:[#allocation6 + $0x98] sm:$0xff] }
 0x176   :  { %2069 = vmatmul.msk.bf16.vlgmr.msra.gmra.mxu3 %vm202_vm5, %v2569_v24 }
 0x177   :  { %943 = vmatpush.bf16.msra.mxu3 %v934_v43  ;;  %v645_v43 = vld [vmem:[#allocation6 + $0x128] sm:$0xff] }
 0x186   :  { %2070 = vmatmul.msk.bf16.gmra.mxu3 %vm202_vm5, %v2582_v53  ;;  %v2484_v53 = vmov 0.0  }
 0x187   :  { %55 = vst.msk [vmem:[#allocation2] sm:$0xff] %vm54_vm10, %v2484_v53 }
 0x188   :  { %56 = vst.msk [vmem:[#allocation2 + $0x8] sm:$0xff] %vm54_vm10, %v2484_v53 }
 0x189   :  { %57 = vst.msk [vmem:[#allocation2 + $0x10] sm:$0xff] %vm54_vm10, %v2484_v53 }
 0x18a   :  { %58 = vst.msk [vmem:[#allocation2 + $0x18] sm:$0xff] %vm54_vm10, %v2484_v53  ;;  %v404_v53 = vld [vmem:[#allocation6 + $0xb8] sm:$0xff] }
 0x1ac   :  { %v2623_v56 = vpop.f32.mrf.mxu1 }
 0x1ad   :  { %v567_v57 = vrot.slane %v2623_v56, 7 }
 0x1b2   :  { %v2655_v1 = vpop.f32.mrf.mxu2 }
 0x1b4   :  { %v522_v58 = vpop.f32.mrf.mxu1 }
 0x1b5   :  { %v568_v59 = vrot.slane %v522_v58, 7 }
 0x1b7   :  { %v2629_v60 = vsel %vm265_vm7, %v567_v57, %v568_v59 }
 0x1ba   :  { %v549_v52 = vpop.f32.mrf.mxu2 }
 0x1bc   :  { %v2631_v0 = vpop.f32.mrf.mxu1 }
 0x1bd   :  { %v570_v24 = vrot.slane %v2631_v0, 7  ;;  %v639_v0 = vld [vmem:[#allocation6 + $0x118] sm:$0xff] }
 0x1bf   :  { %v2639_v3 = vsel %vm265_vm7, %v568_v59, %v570_v24  ;;  %v2330_v59 = vld [vmem:[#allocation3 + $0x60] sm:$0xff] }
 0x1c0   :  { %841 = vmatpush.bf16.msrb.mxu0 %v2330_v59 }
 0x1c4   :  { %v2643_v5 = vpop.f32.mrf.mxu1 }
 0x1c5   :  { %v562_v61 = vrot.slane %v2643_v5, 7 }
 0x1cc   :  { %v748_v7 = vpop.f32.mrf.mxu1 }
 0x1cd   :  { %v755_v10 = vmul.f32 %v753_v8, %v748_v7  ;;  %v615_v8 = vrot.slane %v2655_v1, 1 }
 0x1cf   :  { %v759_v13 = vadd.f32 %v757_v11, %v755_v10  ;;  %v616_v10 = vrot.slane %v549_v52, 1  ;;  %v638_v52 = vld [vmem:[#allocation6 + $0x110] sm:$0xff] }
 0x1d1   :  { %v761_v19 = vmul.f32 0.2, %v759_v13  ;;  %v617_v14 = vsel %vm314_vm8, %v615_v8, %v616_v10 }
 0x1d3   :  { %v763_v27 = vmax.f32 %v759_v13, %v761_v19  ;;  %v628_v19 = vmul.f32 %v617_v14, %v2592_v2 }
 0x1d4   :  { %v750_v15 = vpop.f32.mrf.mxu1 }
 0x1d5   :  { %v756_v18 = vmul.f32 %v754_v12, %v750_v15  ;;  %v577_v12 = vsel %vm265_vm7, %v562_v61, %v567_v57  ;;  %v552_v15 = vpop.f32.mrf.mxu2 }
 0x1d6   :  { %v578_v5 = vmul.f32 %v577_v12, %v2590_v62 }
 0x1d7   :  { %v760_v20 = vadd.f32 %v758_v16, %v756_v18 }
 0x1d9   :  { %v762_v23 = vmul.f32 0.2, %v760_v20  ;;  %v383_v25 = vpop.f32.mrf.mxu3 }
 0x1da   :  { %v397_v30 = vmul.f32 %v393_v22, %v383_v25 }
 0x1db   :  { %v764_v29 = vmax.f32 %v760_v20, %v762_v23  ;;  %v618_v20 = vrot.slane %v552_v15, 1  ;;  %v636_v23 = vld [vmem:[#allocation6 + $0x100] sm:$0xff] }
 0x1dc   :  { %v405_v32 = vadd.f32 %v401_v28, %v397_v30 }
 0x1dd   :  { %v2646_v31 = vpack.c.bf16 %v764_v29, %v763_v27  ;;  %v619_v56 = vsel %vm314_vm8, %v616_v10, %v618_v20  ;;  %v579_v27 = vmul.f32 %v2629_v60, %v2575_v41  ;;  %v644_v29 = vld [vmem:[#allocation6 + $0x120] sm:$0xff] }
 0x1de   :  { %v409_v33 = vmul.f32 0.2, %v405_v32 }
 0x1df   :  { %2082 = vmatmul.msk.bf16.vlgmr.msrb.gmra.mxu2 %vm202_vm5, %v2646_v31  ;;  %2087 = vmatmul.msk.bf16.vlgmr.msrb.gmra.mxu3 %vm202_vm5, %v2646_v31 }
 0x1e0   :  { %v413_v35 = vmax.f32 %v405_v32, %v409_v33  ;;  %v554_v33 = vpop.f32.mrf.mxu2 }
 0x1e1   :  { %v385_v36 = vpop.f32.mrf.mxu3  ;;  %v620_v42 = vrot.slane %v554_v33, 1 }
 0x1e2   :  { %417 = vst.msk [vmem:[#allocation2] sm:$0xff] %vm363_vm9, %v413_v35  ;;  %v398_v38 = vmul.f32 %v394_v34, %v385_v36  ;;  %v629_v35 = vmul.f32 %v619_v56, %v2579_v51  ;;  %v580_v51 = vmul.f32 %v2639_v3, %v2599_v9  ;;  %v910_v3 = vld [vmem:[#allocation3 + $0x80] sm:$0xf] }
 0x1e3   :  { %v621_v41 = vsel %vm314_vm8, %v618_v20, %v620_v42 }
 0x1e4   :  { %v406_v4 = vadd.f32 %v402_v37, %v398_v38  ;;  %v637_v37 = vld [vmem:[#allocation6 + $0x108] sm:$0xff] }
 0x1e6   :  { %v410_v44 = vmul.f32 0.2, %v406_v4 }
 0x1e8   :  { %v414_v46 = vmax.f32 %v406_v4, %v410_v44 }
 0x1e9   :  { %v388_v47 = vpop.f32.mrf.mxu3 }
 0x1ea   :  { %418 = vst.msk [vmem:[#allocation2 + $0x8] sm:$0xff] %vm363_vm9, %v414_v46  ;;  %v399_v49 = vmul.f32 %v395_v45, %v388_v47  ;;  %v630_v47 = vmul.f32 %v621_v41, %v2606_v21  ;;  %v962_v21 = vsel %vm370_vm6, %v910_v3, 0 }
 0x1ec   :  { %v407_v50 = vadd.f32 %v403_v48, %v399_v49 }
 0x1ee   :  { %v411_v54 = vmul.f32 0.2, %v407_v50 }
 0x1f0   :  { %v415_v58 = vmax.f32 %v407_v50, %v411_v54  ;;  %v572_v54 = vsel %vm265_vm7, %v570_v24, %v562_v61  ;;  %v647_v61 = vld [vmem:[#allocation6 + $0x138] sm:$0xff] }
 0x1f1   :  { %v390_v63 = vpop.f32.mrf.mxu3  ;;  %v421_v25 = vld [vmem:[#allocation2] ss:$2 sm:$0xff]  ;;  %v425_v57 = vld [vmem:[#allocation2 + $0x1] ss:$2 sm:$0xff]  ;;  %v581_v9 = vmul.f32 %v572_v54, %v2596_v6 }
 0x1f2   :  { %419 = vst.msk [vmem:[#allocation2 + $0x10] sm:$0xff] %vm363_vm9, %v415_v58  ;;  %v400_v7 = vmul.f32 %v396_v55, %v390_v63  ;;  %v428_v2 = vmax.f32 %v421_v25, %v425_v57  ;;  %v627_v58 = vsel %vm314_vm8, %v620_v42, %v615_v8  ;;  %v646_v63 = vld [vmem:[#allocation6 + $0x130] sm:$0xff]  ;;  %v700_v25 = vld [vmem:[#allocation6 + $0x168] sm:$0xff]  ;;  %v2697_v54 = vld [vmem:[#allocation6 + $0x2a0] sm:$0xff] }
 0x1f3   :  { %v631_v10 = vmul.f32 %v627_v58, %v2610_v26  ;;  %v691_v26 = vld [vmem:[#allocation6 + $0x140] sm:$0xff] }
 0x1f4   :  { %v408_v11 = vadd.f32 %v404_v53, %v400_v7 }
 0x1f6   :  { %v412_v13 = vmul.f32 0.2, %v408_v11 }
 0x1f8   :  { %v416_v16 = vmax.f32 %v408_v11, %v412_v13 }
 0x1f9   :  { %v597_v17 = vpop.f32.mrf.mxu3 }
 0x1fa   :  { %420 = vst.msk [vmem:[#allocation2 + $0x18] sm:$0xff] %vm363_vm9, %v416_v16  ;;  %v598_v18 = vadd.f32 %v597_v17, %v578_v5  ;;  %v699_v17 = vld [vmem:[#allocation6 + $0x160] sm:$0xff] }
 0x1fc   :  { %v632_v22 = vadd.f32 %v628_v19, %v598_v18 }
 0x1fe   :  { %v640_v28 = vmul.f32 %v636_v23, %v632_v22  ;;  %v692_v22 = vld [vmem:[#allocation6 + $0x148] sm:$0xff] }
 0x200   :  { %v648_v38 = vadd.f32 %v644_v29, %v640_v28  ;;  %v1015_v28 = vld [vmem:[#allocation3 + $0x90] sm:$0xf] }
 0x201   :  { %v599_v30 = vpop.f32.mrf.mxu3  ;;  %v423_v62 = vld [vmem:[#allocation2 + $0x10] ss:$2 sm:$0xff]  ;;  %v427_v32 = vld [vmem:[#allocation2 + $0x11] ss:$2 sm:$0xff]  ;;  %v1017_v29 = vsel %vm370_vm6, %v1015_v28, 0 }
 0x202   :  { %v600_v34 = vadd.f32 %v599_v30, %v579_v27  ;;  %v429_v36 = vmax.f32 %v423_v62, %v427_v32  ;;  %v652_v60 = vmul.f32 0.2, %v648_v38  ;;  %v1033_v27 = vld [vmem:[#allocation3 + $0xa0] sm:$0xf]  ;;  %v876_v32 = vld [vmem:[#allocation3 + $0x70] sm:$0xf]  ;;  %1026 = vmatpush.bf16.msrb.mxu2 %v1017_v29 }
 0x203   :  { %v881_v33 = vsel %vm370_vm6, %v876_v32, 0 }
 0x204   :  { %v633_v39 = vadd.f32 %v629_v35, %v600_v34  ;;  %v909_v40 = vpack.c.bf16 %v429_v36, %v428_v2  ;;  %v656_v48 = vmax.f32 %v648_v38, %v652_v60  ;;  %890 = vmatpush.bf16.msrb.mxu1 %v881_v33  ;;  %v693_v2 = vld [vmem:[#allocation6 + $0x150] sm:$0xff] }
 0x205   :  { %v701_v38 = vld [vmem:[#allocation6 + $0x170] sm:$0xff] }
 0x206   :  { %v641_v1 = vmul.f32 %v637_v37, %v633_v39  ;;  %2094 = vmatmul.msk.bf16.vlgmr.msra.gmra.mxu2 %vm363_vm9, %v909_v40  ;;  %2095 = vmatmul.msk.bf16.vlgmr.msra.gmra.mxu3 %vm363_vm9, %v909_v40  ;;  %v1119_v33 = vld [vmem:[#allocation3 + $0xb8] sm:$0xf] }
 0x208   :  { %v649_v4 = vadd.f32 %v645_v43, %v641_v1  ;;  %v694_v1 = vld [vmem:[#allocation6 + $0x158] sm:$0xff] }
 0x209   :  { %v602_v44 = vpop.f32.mrf.mxu3 }
 0x20a   :  { %v653_v45 = vmul.f32 0.2, %v649_v4  ;;  %v603_v46 = vadd.f32 %v602_v44, %v580_v51  ;;  %v702_v44 = vld [vmem:[#allocation6 + $0x178] sm:$0xff] }
 0x20c   :  { %v657_v49 = vmax.f32 %v649_v4, %v653_v45  ;;  %v634_v50 = vadd.f32 %v630_v47, %v603_v46  ;;  %v992_v46 = vld [vmem:[#allocation3 + $0x98] sm:$0xf] }
 0x20e   :  { %v660_v55 = vpack.c.bf16 %v657_v49, %v656_v48  ;;  %v642_v59 = vmul.f32 %v638_v52, %v634_v50  ;;  %v997_v49 = vsel %vm370_vm6, %v992_v46, 0 }
 0x20f   :  { %1006 = vmatpush.bf16.msra.mxu1 %v997_v49 }
 0x210   :  { %2071 = vmatmul.msk.bf16.vlgmr.msra.gmra.mxu0 %vm363_vm9, %v660_v55  ;;  %v650_v11 = vadd.f32 %v646_v63, %v642_v59 }
 0x211   :  { %v604_v53 = vpop.f32.mrf.mxu3  ;;  %971 = vmatpush.bf16.msra.mxu0 %v962_v21 }
 0x212   :  { %v605_v7 = vadd.f32 %v604_v53, %v581_v9  ;;  %v654_v13 = vmul.f32 0.2, %v650_v11  ;;  %v2701_v9 = vld [vmem:[#allocation6 + $0x2b0] sm:$0xff] }
 0x214   :  { %v635_v24 = vadd.f32 %v631_v10, %v605_v7  ;;  %v658_v15 = vmax.f32 %v650_v11, %v654_v13  ;;  %v2706_v11 = vld [vmem:[#allocation6 + $0x2a8] sm:$0xff] }
 0x216   :  { %v643_v12 = vmul.f32 %v639_v0, %v635_v24  ;;  %v863_v0 = vld [vmem:[#allocation6 + $0x1a0] sm:$0xff] }
 0x218   :  { %v651_v8 = vadd.f32 %v647_v61, %v643_v12  ;;  %v2710_v12 = vld [vmem:[#allocation6 + $0x2b8] sm:$0xff] }
 0x21a   :  { %v655_v14 = vmul.f32 0.2, %v651_v8 }
 0x21c   :  { %v659_v16 = vmax.f32 %v651_v8, %v655_v14 }
 0x21e   :  { %v661_v6 = vpack.c.bf16 %v659_v16, %v658_v15  ;;  %v867_v16 = vld [vmem:[#allocation6 + $0x1b0] sm:$0xff] }
 0x220   :  { %2072 = vmatmul.msk.bf16.gmra.mxu0 %vm363_vm9, %v661_v6 }
 0x230   :  { %2092 = vmatmul.msk.bf16.vlgmr.msrb.gmra.mxu0 %vm202_vm5, %v2646_v31  ;;  %v1035_v31 = vsel %vm370_vm6, %v1033_v27, 0 }
 0x231   :  { %1044 = vmatpush.bf16.msrb.mxu3 %v1035_v31 }
 0x240   :  { %2096 = vmatmul.msk.bf16.vlgmr.msra.gmra.mxu0 %vm363_vm9, %v909_v40 }
 0x262   :  { %v788_v30 = vpop.f32.mrf.mxu2  ;;  %v810_v34 = vpop.f32.mrf.mxu3 }
 0x263   :  { %v821_v47 = vrot.slane %v788_v30, 7  ;;  %v852_v52 = vrot.slane %v810_v34, 1  ;;  %v1121_v34 = vsel %vm370_vm6, %v1119_v33, 0 }
 0x264   :  { %1130 = vmatpush.bf16.msra.mxu2 %v1121_v34 }
 0x26a   :  { %v790_v42 = vpop.f32.mrf.mxu2  ;;  %v812_v41 = vpop.f32.mrf.mxu3 }
 0x26b   :  { %v818_v4 = vrot.slane %v790_v42, 7  ;;  %v853_v48 = vrot.slane %v812_v41, 1  ;;  %v901_v42 = vld [vmem:[#allocation6 + $0x1d0] sm:$0xff] }
 0x26d   :  { %v825_v55 = vsel %vm265_vm7, %v818_v4, %v821_v47  ;;  %v854_v59 = vsel %vm314_vm8, %v852_v52, %v853_v48  ;;  %v822_v24 = vsel %vm265_vm7, %v821_v47, %v818_v4  ;;  %v858_v61 = vsel %vm314_vm8, %v853_v48, %v852_v52 }
 0x26e   :  { %v826_v63 = vmul.f32 %v825_v55, %v2697_v54  ;;  %v859_v7 = vmul.f32 %v854_v59, %v2701_v9  ;;  %v827_v15 = vmul.f32 %v822_v24, %v2706_v11  ;;  %v2333_v24 = vld [vmem:[#allocation3 + $0xc8] sm:$0xff] }
 0x289   :  { %v927_v49 = vpop.f32.mrf.mxu2 }
 0x28d   :  { %v681_v5 = vpop.f32.mrf.mxu0 }
 0x28e   :  { %v695_v18 = vmul.f32 %v691_v26, %v681_v5 }
 0x290   :  { %v703_v19 = vadd.f32 %v699_v17, %v695_v18  ;;  %v860_v18 = vmul.f32 %v858_v61, %v2710_v12 }
 0x291   :  { %v929_v52 = vpop.f32.mrf.mxu2 }
 0x292   :  { %v707_v20 = vmul.f32 0.2, %v703_v19 }
 0x294   :  { %v711_v23 = vmax.f32 %v703_v19, %v707_v20 }
 0x295   :  { %v683_v56 = vpop.f32.mrf.mxu0 }
 0x296   :  { %715 = vst.msk [vmem:[#allocation2] sm:$0xff] %vm363_vm9, %v711_v23  ;;  %v696_v57 = vmul.f32 %v692_v22, %v683_v56  ;;  %v864_v22 = vld [vmem:[#allocation6 + $0x1a8] sm:$0xff] }
 0x298   :  { %v704_v62 = vadd.f32 %v700_v25, %v696_v57  ;;  %v868_v57 = vld [vmem:[#allocation6 + $0x1b8] sm:$0xff] }
 0x29a   :  { %v708_v35 = vmul.f32 0.2, %v704_v62 }
 0x29c   :  { %v712_v36 = vmax.f32 %v704_v62, %v708_v35  ;;  %v1101_v35 = vld [vmem:[#allocation3 + $0xa8] sm:$0xf] }
 0x29d   :  { %v686_v37 = vpop.f32.mrf.mxu0 }
 0x29e   :  { %716 = vst.msk [vmem:[#allocation2 + $0x8] sm:$0xff] %vm363_vm9, %v712_v36  ;;  %v697_v39 = vmul.f32 %v693_v2, %v686_v37  ;;  %v1103_v2 = vsel %vm370_vm6, %v1101_v35, 0  ;;  %v1078_v36 = vld [vmem:[#allocation3 + $0xb0] sm:$0xf] }
 0x29f   :  { %v1083_v37 = vsel %vm370_vm6, %v1078_v36, 0 }
 0x2a0   :  { %v705_v40 = vadd.f32 %v701_v38, %v697_v39  ;;  %1092 = vmatpush.bf16.msrb.mxu0 %v1083_v37  ;;  %v897_v39 = vld [vmem:[#allocation6 + $0x1c0] sm:$0xff] }
 0x2a2   :  { %v709_v43 = vmul.f32 0.2, %v705_v40 }
 0x2a4   :  { %v713_v60 = vmax.f32 %v705_v40, %v709_v43  ;;  %v898_v43 = vld [vmem:[#allocation6 + $0x1c8] sm:$0xff] }
 0x2a5   :  { %v688_v51 = vpop.f32.mrf.mxu0  ;;  %v719_v8 = vld [vmem:[#allocation2] ss:$2 sm:$0xff]  ;;  %v721_v13 = vld [vmem:[#allocation2 + $0x1] ss:$2 sm:$0xff] }
 0x2a6   :  { %717 = vst.msk [vmem:[#allocation2 + $0x10] sm:$0xff] %vm363_vm9, %v713_v60  ;;  %v698_v45 = vmul.f32 %v694_v1, %v688_v51  ;;  %v723_v19 = vmax.f32 %v719_v8, %v721_v13  ;;  %v902_v60 = vld [vmem:[#allocation6 + $0x1d8] sm:$0xff] }
 0x2a8   :  { %v706_v50 = vadd.f32 %v702_v44, %v698_v45 }
 0x2aa   :  { %v710_v58 = vmul.f32 0.2, %v706_v50 }
 0x2ac   :  { %v714_v3 = vmax.f32 %v706_v50, %v710_v58  ;;  %v945_v50 = vpop.f32.mrf.mxu3 }
 0x2ad   :  { %v843_v53 = vpop.f32.mrf.mxu0 }
 0x2ae   :  { %718 = vst.msk [vmem:[#allocation2 + $0x18] sm:$0xff] %vm363_vm9, %v714_v3  ;;  %v844_v21 = vadd.f32 %v843_v53, %v826_v63  ;;  %v951_v63 = vrot.slane %v929_v52, 7 }
 0x2b0   :  { %v861_v10 = vadd.f32 %v859_v7, %v844_v21  ;;  %v954_v7 = vrot.slane %v927_v49, 7 }
 0x2b2   :  { %v865_v14 = vmul.f32 %v863_v0, %v861_v10  ;;  %v2334_v10 = vld [vmem:[#allocation3 + $0xc0] sm:$0xff]  ;;  %v2335_v0 = vld [vmem:[#allocation3 + $0xd0] sm:$0xff]  ;;  %v958_v8 = vsel %vm265_vm7, %v951_v63, %v954_v7  ;;  %v955_v13 = vsel %vm265_vm7, %v954_v7, %v951_v63 }
 0x2b3   :  { %1196 = vmatpush.bf16.msra.mxu3 %v2334_v10  ;;  %1218 = vmatpush.bf16.msra.mxu0 %v2335_v0  ;;  %v1163_v10 = vld [vmem:[#allocation6 + $0x1e0] sm:$0xff]  ;;  %v1164_v0 = vld [vmem:[#allocation6 + $0x1e8] sm:$0xff] }
 0x2b4   :  { %v869_v23 = vadd.f32 %v867_v16, %v865_v14  ;;  %v947_v58 = vpop.f32.mrf.mxu3  ;;  %v959_v16 = vmul.f32 %v958_v8, %v2697_v54  ;;  %v1167_v8 = vld [vmem:[#allocation6 + $0x1f0] sm:$0xff] }
 0x2b5   :  { %v845_v6 = vpop.f32.mrf.mxu0  ;;  %v720_v26 = vld [vmem:[#allocation2 + $0x10] ss:$2 sm:$0xff]  ;;  %v722_v5 = vld [vmem:[#allocation2 + $0x11] ss:$2 sm:$0xff]  ;;  %v981_v61 = vrot.slane %v947_v58, 1 }
 0x2b6   :  { %v846_v17 = vadd.f32 %v845_v6, %v827_v15  ;;  %v724_v20 = vmax.f32 %v720_v26, %v722_v5  ;;  %v871_v27 = vmul.f32 0.2, %v869_v23  ;;  %v980_v15 = vrot.slane %v945_v50, 1 }
 0x2b7   :  { %v960_v6 = vmul.f32 %v955_v13, %v2706_v11  ;;  %v1168_v13 = vld [vmem:[#allocation6 + $0x1f8] sm:$0xff] }
 0x2b8   :  { %v862_v56 = vadd.f32 %v860_v18, %v846_v17  ;;  %v991_v25 = vpack.c.bf16 %v724_v20, %v723_v19  ;;  %v873_v30 = vmax.f32 %v869_v23, %v871_v27  ;;  %v982_v5 = vsel %vm314_vm8, %v980_v15, %v981_v61 }
 0x2b9   :  { %v986_v17 = vsel %vm314_vm8, %v981_v61, %v980_v15 }
 0x2ba   :  { %v866_v28 = vmul.f32 %v864_v22, %v862_v56  ;;  %2098 = vmatmul.msk.bf16.vlgmr.msrb.gmra.mxu2 %vm363_vm9, %v991_v25  ;;  %2099 = vmatmul.msk.bf16.vlgmr.msrb.gmra.mxu3 %vm363_vm9, %v991_v25  ;;  %v987_v56 = vmul.f32 %v982_v5, %v2701_v9 }
 0x2bc   :  { %v870_v29 = vadd.f32 %v868_v57, %v866_v28 }
 0x2bd   :  { %v973_v59 = vpop.f32.mrf.mxu0 }
 0x2be   :  { %v872_v31 = vmul.f32 0.2, %v870_v29  ;;  %v974_v19 = vadd.f32 %v973_v59, %v959_v16 }
 0x2c0   :  { %v874_v62 = vmax.f32 %v870_v29, %v872_v31  ;;  %v989_v27 = vadd.f32 %v987_v56, %v974_v19  ;;  %v2336_v56 = vld [vmem:[#allocation3 + $0xe0] sm:$0xff] }
 0x2c2   :  { %v875_v32 = vpack.c.bf16 %v874_v62, %v873_v30 }
 0x2c4   :  { %2093 = vmatmul.msk.bf16.vlgmr.msrb.gmra.mxu1 %vm363_vm9, %v875_v32 }
 0x2c5   :  { %1112 = vmatpush.bf16.msrb.mxu1 %v1103_v2  ;;  %v975_v14 = vpop.f32.mrf.mxu0 }
 0x2c6   :  { %v976_v20 = vadd.f32 %v975_v14, %v960_v6 }
 0x2d4   :  { %2097 = vmatmul.msk.bf16.vlgmr.msra.gmra.mxu1 %vm363_vm9, %v991_v25  ;;  %v988_v25 = vmul.f32 %v986_v17, %v2710_v12 }
 0x2d5   :  { %1249 = vmatpush.bf16.msra.mxu1 %v2333_v24 }
 0x2d6   :  { %v990_v29 = vadd.f32 %v988_v25, %v976_v20 }
 0x33d   :  { %v1028_v3 = vpop.f32.mrf.mxu2  ;;  %v1046_v21 = vpop.f32.mrf.mxu3 }
 0x33e   :  { %v1055_v57 = vrot.slane %v1028_v3, 7  ;;  %v1066_v35 = vrot.slane %v1046_v21, 1 }
 0x341   :  { %v892_v38 = vpop.f32.mrf.mxu1 }
 0x342   :  { %v899_v40 = vmul.f32 %v897_v39, %v892_v38 }
 0x344   :  { %v903_v1 = vadd.f32 %v901_v42, %v899_v40 }
 0x345   :  { %v1030_v26 = vpop.f32.mrf.mxu2  ;;  %v1048_v23 = vpop.f32.mrf.mxu3 }
 0x346   :  { %v905_v51 = vmul.f32 0.2, %v903_v1  ;;  %v1052_v22 = vrot.slane %v1030_v26, 7  ;;  %v1067_v62 = vrot.slane %v1048_v23, 1  ;;  %v2338_v23 = vld [vmem:[#allocation3 + $0xe8] sm:$0xff] }
 0x347   :  { %1328 = vmatpush.bf16.msrb.mxu3 %v2338_v23 }
 0x348   :  { %v907_v46 = vmax.f32 %v903_v1, %v905_v51  ;;  %v1056_v31 = vsel %vm265_vm7, %v1055_v57, %v1052_v22  ;;  %v1059_v30 = vsel %vm265_vm7, %v1052_v22, %v1055_v57  ;;  %v1068_v39 = vsel %vm314_vm8, %v1066_v35, %v1067_v62  ;;  %v2337_v22 = vld [vmem:[#allocation3 + $0xd8] sm:$0xff] }
 0x349   :  { %v894_v41 = vpop.f32.mrf.mxu1  ;;  %v1060_v36 = vmul.f32 %v1059_v30, %v2697_v54  ;;  %v1061_v37 = vmul.f32 %v1056_v31, %v2706_v11  ;;  %v1072_v40 = vsel %vm314_vm8, %v1067_v62, %v1066_v35  ;;  %1307 = vmatpush.bf16.msrb.mxu2 %v2337_v22 }
 0x34a   :  { %v900_v4 = vmul.f32 %v898_v43, %v894_v41  ;;  %v1074_v51 = vmul.f32 %v1072_v40, %v2710_v12 }
 0x34c   :  { %v904_v44 = vadd.f32 %v902_v60, %v900_v4  ;;  %v1073_v4 = vmul.f32 %v1068_v39, %v2701_v9 }
 0x34e   :  { %v906_v45 = vmul.f32 0.2, %v904_v44 }
 0x350   :  { %v908_v47 = vmax.f32 %v904_v44, %v906_v45 }
 0x351   :  { %v1008_v55 = vpop.f32.mrf.mxu1 }
 0x352   :  { %v1077_v48 = vpack.c.bf16 %v908_v47, %v907_v46  ;;  %v1013_v32 = vadd.f32 %v1008_v55, %v989_v27 }
 0x354   :  { %2100 = vmatmul.msk.bf16.vlgmr.msrb.gmra.mxu0 %vm363_vm9, %v1077_v48  ;;  %2101 = vmatmul.msk.bf16.vlgmr.msrb.gmra.mxu1 %vm363_vm9, %v1077_v48  ;;  %v1062_v43 = vadd.f32 %v1060_v36, %v1013_v32 }
 0x355   :  { %2102 = vmatmul.msk.bf16.vlgmr.msra.gmra.mxu2 %vm363_vm9, %v1077_v48  ;;  %1353 = vmatpush.bf16.msrb.mxu0 %v2336_v56 }
 0x356   :  { %v1075_v45 = vadd.f32 %v1073_v4, %v1062_v43  ;;  %v1269_v43 = vld [vmem:[#allocation6 + $0x200] sm:$0xff]  ;;  %v1273_v4 = vld [vmem:[#allocation6 + $0x210] sm:$0xff] }
 0x359   :  { %v1010_v53 = vpop.f32.mrf.mxu1 }
 0x35a   :  { %v1014_v33 = vadd.f32 %v1010_v53, %v990_v29 }
 0x35c   :  { %v1063_v1 = vadd.f32 %v1061_v37, %v1014_v33 }
 0x35e   :  { %v1076_v46 = vadd.f32 %v1074_v51, %v1063_v1  ;;  %v1270_v1 = vld [vmem:[#allocation6 + $0x208] sm:$0xff]  ;;  %v1274_v51 = vld [vmem:[#allocation6 + $0x218] sm:$0xff] }
 0x3d1   :  { %v1114_v18 = vpop.f32.mrf.mxu1  ;;  %v1094_v28 = vpop.f32.mrf.mxu0 }
 0x3d2   :  { %v1141_v42 = vrot.slane %v1114_v18, 7  ;;  %v1099_v55 = vadd.f32 %v1094_v28, %v1075_v45 }
 0x3d8   :  { %v1132_v34 = vpop.f32.mrf.mxu2 }
 0x3d9   :  { %v1116_v2 = vpop.f32.mrf.mxu1  ;;  %v1096_v44 = vpop.f32.mrf.mxu0  ;;  %v1152_v50 = vrot.slane %v1132_v34, 1 }
 0x3da   :  { %v1138_v38 = vrot.slane %v1116_v2, 7  ;;  %v1100_v58 = vadd.f32 %v1096_v44, %v1076_v46 }
 0x3dc   :  { %v1142_v41 = vsel %vm265_vm7, %v1141_v42, %v1138_v38  ;;  %v1145_v60 = vsel %vm265_vm7, %v1138_v38, %v1141_v42 }
 0x3dd   :  { %v1146_v47 = vmul.f32 %v1145_v60, %v2697_v54  ;;  %v1147_v48 = vmul.f32 %v1142_v41, %v2706_v11 }
 0x3df   :  { %v1148_v63 = vadd.f32 %v1146_v47, %v1099_v55  ;;  %v1149_v53 = vadd.f32 %v1147_v48, %v1100_v58  ;;  %v2344_v55 = vld [vmem:[#allocation3 + $0x118] sm:$0xff]  ;;  %v2340_v58 = vld [vmem:[#allocation3 + $0x108] sm:$0xff] }
 0x3e0   :  { %v1134_v49 = vpop.f32.mrf.mxu2  ;;  %1431 = vmatpush.bf16.msra.mxu2 %v2344_v55  ;;  %v2355_v55 = vld [vmem:[#allocation3 + $0x150] sm:$0xff] }
 0x3e1   :  { %v1153_v52 = vrot.slane %v1134_v49, 1 }
 0x3e3   :  { %v1154_v59 = vsel %vm314_vm8, %v1152_v50, %v1153_v52  ;;  %v1158_v3 = vsel %vm314_vm8, %v1153_v52, %v1152_v50 }
 0x3e4   :  { %v1159_v21 = vmul.f32 %v1154_v59, %v2701_v9  ;;  %v1160_v7 = vmul.f32 %v1158_v3, %v2710_v12  ;;  %v2342_v59 = vld [vmem:[#allocation3 + $0xf8] sm:$0xff]  ;;  %v2343_v3 = vld [vmem:[#allocation3 + $0x110] sm:$0xff] }
 0x3e5   :  { %1402 = vmatpush.bf16.msrb.mxu1 %v2342_v59  ;;  %1432 = vmatpush.bf16.msra.mxu2 %v2343_v3  ;;  %v2351_v59 = vld [vmem:[#allocation3 + $0x170] sm:$0xff] }
 0x3e6   :  { %v1161_v24 = vadd.f32 %v1159_v21, %v1148_v63  ;;  %v1162_v61 = vadd.f32 %v1160_v7, %v1149_v53  ;;  %v2339_v63 = vld [vmem:[#allocation3 + $0x100] sm:$0xff]  ;;  %v2341_v53 = vld [vmem:[#allocation3 + $0xf0] sm:$0xff] }
 0x3e8   :  { %v1165_v14 = vmul.f32 %v1163_v10, %v1161_v24  ;;  %v1166_v15 = vmul.f32 %v1164_v0, %v1162_v61  ;;  %v1334_v10 = vld [vmem:[#allocation6 + $0x2c0] sm:$0xff] }
 0x3e9   :  { %1403 = vmatpush.bf16.msrb.mxu1 %v2341_v53 }
 0x3ea   :  { %v1169_v16 = vadd.f32 %v1167_v8, %v1165_v14  ;;  %v1170_v6 = vadd.f32 %v1168_v13, %v1166_v15  ;;  %v1359_v8 = vld [vmem:[#allocation6 + $0x2c8] sm:$0xff] }
 0x3ec   :  { %v1171_v26 = vmul.f32 0.2, %v1169_v16  ;;  %v1172_v5 = vmul.f32 0.2, %v1170_v6 }
 0x3ee   :  { %v1173_v17 = vmax.f32 %v1169_v16, %v1171_v26  ;;  %v1174_v18 = vmax.f32 %v1170_v6, %v1172_v5  ;;  %v1366_v6 = vld [vmem:[#allocation6 + $0x220] sm:$0xff]  ;;  %v1368_v5 = vld [vmem:[#allocation6 + $0x228] sm:$0xff] }
 0x3f0   :  { %v1175_v19 = vpack.c.bf16 %v1174_v18, %v1173_v17 }
 0x3f2   :  { %2107 = vmatmul.msk.bf16.vlgmr.msra.gmra.mxu3 %vm202_vm5, %v1175_v19  ;;  %2112 = vmatmul.msk.bf16.vlgmr.msra.gmra.mxu0 %vm202_vm5, %v1175_v19 }
 0x3f3   :  { %2117 = vmatmul.msk.bf16.vlgmr.msra.gmra.mxu1 %vm202_vm5, %v1175_v19  ;;  %1461 = vmatpush.bf16.msra.mxu3 %v2340_v58  ;;  %v2359_v58 = vld [vmem:[#allocation3 + $0x190] sm:$0xff] }
 0x3f7   :  { %1462 = vmatpush.bf16.msra.mxu3 %v2339_v63 }
 0x46f   :  { %v1220_v20 = vpop.f32.mrf.mxu0 }
 0x470   :  { %v1251_v57 = vpop.f32.mrf.mxu1  ;;  %v1258_v31 = vrot.slane %v1220_v20, 1 }
 0x475   :  { %v1198_v25 = vpop.f32.mrf.mxu3 }
 0x476   :  { %v1229_v30 = vrot.slane %v1198_v25, 7  ;;  %v2346_v25 = vld [vmem:[#allocation3 + $0x138] sm:$0xff] }
 0x477   :  { %v1222_v28 = vpop.f32.mrf.mxu0 }
 0x478   :  { %v1259_v27 = vrot.slane %v1222_v28, 1  ;;  %v1253_v37 = vpop.f32.mrf.mxu1  ;;  %v2350_v28 = vld [vmem:[#allocation3 + $0x148] sm:$0xff] }
 0x479   :  { %1543 = vmatpush.bf16.msra.mxu1 %v2350_v28  ;;  %v2365_v28 = vld [vmem:[#allocation3 + $0x1d8] sm:$0xff] }
 0x47a   :  { %v1260_v32 = vsel %vm314_vm8, %v1258_v31, %v1259_v27  ;;  %v1264_v33 = vsel %vm314_vm8, %v1259_v27, %v1258_v31  ;;  %v2345_v27 = vld [vmem:[#allocation3 + $0x130] sm:$0xff]  ;;  %v2349_v31 = vld [vmem:[#allocation3 + $0x140] sm:$0xff] }
 0x47b   :  { %v1265_v38 = vmul.f32 %v1260_v32, %v2701_v9  ;;  %v1266_v39 = vmul.f32 %v1264_v33, %v2710_v12 }
 0x47d   :  { %v1200_v29 = vpop.f32.mrf.mxu3  ;;  %1544 = vmatpush.bf16.msra.mxu1 %v2349_v31 }
 0x47e   :  { %v1226_v62 = vrot.slane %v1200_v29, 7  ;;  %v2347_v29 = vld [vmem:[#allocation3 + $0x120] sm:$0xff] }
 0x480   :  { %v1230_v34 = vsel %vm265_vm7, %v1229_v30, %v1226_v62  ;;  %v1233_v35 = vsel %vm265_vm7, %v1226_v62, %v1229_v30 }
 0x481   :  { %v1234_v2 = vmul.f32 %v1233_v35, %v2697_v54  ;;  %v1235_v36 = vmul.f32 %v1230_v34, %v2706_v11 }
 0x483   :  { %v1252_v40 = vadd.f32 %v1251_v57, %v1234_v2  ;;  %v1254_v42 = vadd.f32 %v1253_v37, %v1235_v36  ;;  %v2348_v57 = vld [vmem:[#allocation3 + $0x128] sm:$0xff] }
 0x484   :  { %1514 = vmatpush.bf16.msra.mxu0 %v2348_v57  ;;  %v2366_v57 = vld [vmem:[#allocation3 + $0x1e0] sm:$0xff] }
 0x485   :  { %v1267_v41 = vadd.f32 %v1265_v38, %v1252_v40  ;;  %v1268_v60 = vadd.f32 %v1266_v39, %v1254_v42  ;;  %v1474_v38 = vld [vmem:[#allocation6 + $0x230] sm:$0xff]  ;;  %v1476_v40 = vld [vmem:[#allocation6 + $0x238] sm:$0xff] }
 0x487   :  { %v1271_v44 = vmul.f32 %v1269_v43, %v1267_v41  ;;  %v1272_v45 = vmul.f32 %v1270_v1, %v1268_v60 }
 0x488   :  { %1515 = vmatpush.bf16.msra.mxu0 %v2347_v29  ;;  %v2363_v29 = vld [vmem:[#allocation3 + $0x1c8] sm:$0xff] }
 0x489   :  { %v1275_v46 = vadd.f32 %v1273_v4, %v1271_v44  ;;  %v1276_v47 = vadd.f32 %v1274_v51, %v1272_v45 }
 0x48b   :  { %v1277_v54 = vmul.f32 0.2, %v1275_v46  ;;  %v1278_v48 = vmul.f32 0.2, %v1276_v47 }
 0x48d   :  { %v1279_v11 = vmax.f32 %v1275_v46, %v1277_v54  ;;  %v1280_v49 = vmax.f32 %v1276_v47, %v1278_v48  ;;  %v2358_v47 = vld [vmem:[#allocation3 + $0x168] sm:$0xff] }
 0x48e   :  { %v2362_v54 = vld [vmem:[#allocation3 + $0x1a8] sm:$0xff] }
 0x48f   :  { %1281 = vst.msk [vmem:[#allocation2] sm:$0xff] %vm202_vm5, %v1279_v11  ;;  %v2354_v48 = vld [vmem:[#allocation3 + $0x188] sm:$0xff]  ;;  %v2357_v11 = vld [vmem:[#allocation3 + $0x160] sm:$0xff] }
 0x490   :  { %1282 = vst.msk [vmem:[#allocation2 + $0x8] sm:$0xff] %vm202_vm5, %v1280_v49  ;;  %v2361_v49 = vld [vmem:[#allocation3 + $0x1a0] sm:$0xff] }
 0x497   :  { %v1283_v9 = vld [vmem:[#allocation2] ss:$2 sm:$0xff]  ;;  %v1284_v12 = vld [vmem:[#allocation2 + $0x1] ss:$2 sm:$0xff] }
 0x498   :  { %v1285_v50 = vmax.f32 %v1283_v9, %v1284_v12  ;;  %v2353_v9 = vld [vmem:[#allocation3 + $0x180] sm:$0xff]  ;;  %v2356_v12 = vld [vmem:[#allocation3 + $0x158] sm:$0xff] }
 0x49a   :  { %v1286_v52 = vpack.c.bf16 %v1285_v50, %v1285_v50  ;;  %v2360_v50 = vld [vmem:[#allocation3 + $0x198] sm:$0xff] }
 0x49c   :  { %2122 = vmatmul.msk.bf16.vlgmr.msrb.gmra.mxu2 %vm202_vm5, %v1286_v52  ;;  %2127 = vmatmul.msk.bf16.vlgmr.msrb.gmra.mxu3 %vm202_vm5, %v1286_v52 }
 0x49d   :  { %2132 = vmatmul.msk.bf16.vlgmr.msrb.gmra.mxu0 %vm202_vm5, %v1286_v52  ;;  %1576 = vmatpush.bf16.msrb.mxu2 %v2346_v25  ;;  %v2352_v52 = vld [vmem:[#allocation3 + $0x178] sm:$0xff] }
 0x49e   :  { %1646 = vmatpush.bf16.msrb.mxu3 %v2358_v47  ;;  %1691 = vmatpush.bf16.msrb.mxu0 %v2362_v54  ;;  %v2370_v54 = vld [vmem:[#allocation3 + $0x200] sm:$0xff] }
 0x4a1   :  { %1577 = vmatpush.bf16.msrb.mxu2 %v2345_v27  ;;  %v2364_v27 = vld [vmem:[#allocation3 + $0x1d0] sm:$0xff] }
 0x4a2   :  { %1647 = vmatpush.bf16.msrb.mxu3 %v2357_v11  ;;  %1692 = vmatpush.bf16.msrb.mxu0 %v2361_v49 }
 0x4a6   :  { %1648 = vmatpush.bf16.msrb.mxu3 %v2356_v12  ;;  %1693 = vmatpush.bf16.msrb.mxu0 %v2360_v50 }
 0x4aa   :  { %1649 = vmatpush.bf16.msrb.mxu3 %v2355_v55  ;;  %1694 = vmatpush.bf16.msrb.mxu0 %v2359_v58  ;;  %v2368_v55 = vld [vmem:[#allocation3 + $0x1f0] sm:$0xff]  ;;  %v2367_v58 = vld [vmem:[#allocation3 + $0x1e8] sm:$0xff] }
 0x51a   :  { %v1355_v21 = vpop.f32.mrf.mxu0 }
 0x51f   :  { %v1309_v7 = vpop.f32.mrf.mxu2  ;;  %v1330_v0 = vpop.f32.mrf.mxu3 }
 0x520   :  { %v1336_v24 = vrot.slane %v1309_v7, 7  ;;  %v1361_v61 = vrot.slane %v1330_v0, 1  ;;  %v1550_v0 = vld [vmem:[#allocation6 + $0x2d0] sm:$0xf] }
 0x522   :  { %v1339_v13 = vmul.f32 %v1336_v24, %v1334_v10  ;;  %v1357_v14 = vpop.f32.mrf.mxu0  ;;  %v1364_v16 = vmul.f32 %v1361_v61, %v1359_v8 }
 0x524   :  { %v1356_v15 = vadd.f32 %v1355_v21, %v1339_v13 }
 0x526   :  { %v1365_v26 = vadd.f32 %v1364_v16, %v1356_v15 }
 0x527   :  { %v1311_v17 = vpop.f32.mrf.mxu2  ;;  %v1332_v18 = vpop.f32.mrf.mxu3 }
 0x528   :  { %v1367_v19 = vmul.f32 %v1366_v6, %v1365_v26  ;;  %v1594_v18 = vld [vmem:[#allocation6 + $0x248] sm:$0xf] }
 0x52a   :  { %v1369_v20 = vadd.f32 %v1368_v5, %v1367_v19  ;;  %v1592_v5 = vld [vmem:[#allocation6 + $0x240] sm:$0xf] }
 0x52c   :  { %v1370_v22 = vmul.f32 0.2, %v1369_v20 }
 0x52e   :  { %v1371_v23 = vmax.f32 %v1369_v20, %v1370_v22 }
 0x530   :  { %v1372_v56 = vpack.c.bf16 %v1371_v23, %v1371_v23 }
 0x532   :  { %2141 = vmatmul.msk.bf16.vlgmr.msrb.gmra.mxu1 %vm83_vm2, %v1372_v56  ;;  %2150 = vmatmul.msk.bf16.vlgmr.msra.gmra.mxu2 %vm83_vm2, %v1372_v56 }
 0x533   :  { %2159 = vmatmul.msk.bf16.vlgmr.msra.gmra.mxu3 %vm83_vm2, %v1372_v56  ;;  %1735 = vmatpush.bf16.msrb.mxu1 %v2354_v48 }
 0x534   :  { %1805 = vmatpush.bf16.msra.mxu2 %v2366_v57 }
 0x537   :  { %1736 = vmatpush.bf16.msrb.mxu1 %v2353_v9 }
 0x538   :  { %1806 = vmatpush.bf16.msra.mxu2 %v2365_v28 }
 0x53b   :  { %1737 = vmatpush.bf16.msrb.mxu1 %v2352_v52  ;;  %v2369_v52 = vld [vmem:[#allocation3 + $0x1f8] sm:$0xff] }
 0x53c   :  { %1807 = vmatpush.bf16.msra.mxu2 %v2364_v27 }
 0x53f   :  { %1738 = vmatpush.bf16.msrb.mxu1 %v2351_v59  ;;  %v2382_v59 = vld [vmem:[#allocation3 + $0x260] sm:$0xff] }
 0x540   :  { %1808 = vmatpush.bf16.msra.mxu2 %v2363_v29 }
 0x5af   :  { %v1405_v30 = vpop.f32.mrf.mxu1 }
 0x5b0   :  { %v1439_v62 = vrot.slane %v1405_v30, 7 }
 0x5b2   :  { %v1442_v34 = vmul.f32 %v1439_v62, %v1334_v10  ;;  %v2374_v62 = vld [vmem:[#allocation3 + $0x220] sm:$0xff] }
 0x5b3   :  { %1889 = vmatpush.bf16.msra.mxu3 %v2374_v62 }
 0x5b5   :  { %v1434_v32 = vpop.f32.mrf.mxu2 }
 0x5b6   :  { %v1469_v33 = vrot.slane %v1434_v32, 1  ;;  %v1464_v35 = vpop.f32.mrf.mxu3 }
 0x5b7   :  { %v1407_v2 = vpop.f32.mrf.mxu1  ;;  %v1465_v37 = vadd.f32 %v1464_v35, %v1442_v34  ;;  %v2373_v35 = vld [vmem:[#allocation3 + $0x218] sm:$0xff] }
 0x5b8   :  { %v1472_v36 = vmul.f32 %v1469_v33, %v1359_v8  ;;  %v1583_v8 = vld [vmem:[#allocation6 + $0x2d8] sm:$0xf]  ;;  %1890 = vmatpush.bf16.msra.mxu3 %v2373_v35 }
 0x5ba   :  { %v1473_v39 = vadd.f32 %v1472_v36, %v1465_v37 }
 0x5bc   :  { %v1475_v42 = vmul.f32 %v1474_v38, %v1473_v39 }
 0x5bd   :  { %v1436_v43 = vpop.f32.mrf.mxu2 }
 0x5be   :  { %v1477_v1 = vadd.f32 %v1476_v40, %v1475_v42  ;;  %v1466_v41 = vpop.f32.mrf.mxu3  ;;  %v2372_v43 = vld [vmem:[#allocation3 + $0x210] sm:$0xff] }
 0x5bf   :  { %1891 = vmatpush.bf16.msra.mxu3 %v2372_v43 }
 0x5c0   :  { %v1478_v60 = vmul.f32 0.2, %v1477_v1 }
 0x5c2   :  { %v1479_v4 = vmax.f32 %v1477_v1, %v1478_v60  ;;  %v1752_v60 = vld [vmem:[#allocation6 + $0x250] sm:$0xf] }
 0x5c4   :  { %1480 = vst.msk [vmem:[#allocation2] sm:$0xff] %vm83_vm2, %v1479_v4 }
 0x5cb   :  { %v1481_v51 = vld [vmem:[#allocation2] ss:$2 sm:$0xf]  ;;  %v1482_v44 = vld [vmem:[#allocation2 + $0x1] ss:$2 sm:$0xf] }
 0x5cc   :  { %v1483_v45 = vmax.f32 %v1481_v51, %v1482_v44  ;;  %v2371_v44 = vld [vmem:[#allocation3 + $0x208] sm:$0xff] }
 0x5cd   :  { %1892 = vmatpush.bf16.msra.mxu3 %v2371_v44 }
 0x5ce   :  { %v1484_v46 = vpack.c.bf16 %v1483_v45, %v1483_v45  ;;  %v1754_v45 = vld [vmem:[#allocation6 + $0x258] sm:$0xf] }
 0x5d0   :  { %2168 = vmatmul.msk.bf16.vlgmr.msra.gmra.mxu0 %vm83_vm2, %v1484_v46  ;;  %2177 = vmatmul.msk.bf16.vlgmr.msra.gmra.mxu1 %vm83_vm2, %v1484_v46 }
 0x5d1   :  { %2186 = vmatmul.msk.bf16.vlgmr.msrb.gmra.mxu2 %vm83_vm2, %v1484_v46  ;;  %1893 = vmatpush.bf16.msra.mxu3 %v2370_v54 }
 0x5d2   :  { %1977 = vmatpush.bf16.msra.mxu0 %v2382_v59 }
 0x5d5   :  { %1894 = vmatpush.bf16.msra.mxu3 %v2369_v52 }
 0x5d9   :  { %1895 = vmatpush.bf16.msra.mxu3 %v2368_v55 }
 0x5dd   :  { %1896 = vmatpush.bf16.msra.mxu3 %v2367_v58 }
 0x64d   :  { %v1517_v3 = vpop.f32.mrf.mxu0  ;;  %v1546_v63 = vpop.f32.mrf.mxu1 }
 0x64e   :  { %v1552_v53 = vrot.slane %v1517_v3, 3  ;;  %v1554_v21 = vrot.slane %v1517_v3, 7  ;;  %v1585_v7 = vrot.slane %v1546_v63, 1  ;;  %v1587_v10 = vrot.slane %v1546_v63, 5  ;;  %v2381_v3 = vld [vmem:[#allocation3 + $0x258] sm:$0xff]  ;;  %v2380_v63 = vld [vmem:[#allocation3 + $0x250] sm:$0xff] }
 0x64f   :  { %1978 = vmatpush.bf16.msra.mxu0 %v2381_v3 }
 0x650   :  { %v1556_v24 = vsel %vm265_vm7, %v1552_v53, %v1554_v21  ;;  %v1589_v13 = vsel %vm143_vm0, %v1585_v7, %v1587_v10  ;;  %v2379_v53 = vld [vmem:[#allocation3 + $0x248] sm:$0xff]  ;;  %v2378_v21 = vld [vmem:[#allocation3 + $0x240] sm:$0xff] }
 0x651   :  { %v1557_v61 = vmul.f32 %v1556_v24, %v1550_v0  ;;  %v1590_v16 = vmul.f32 %v1589_v13, %v1583_v8  ;;  %v2393_v7 = vld [vmem:[%s2807_s4] ss:$0 sm:$0xff]  ;;  %v2394_v10 = vld [vmem:[%s2807_s4 + $0x1] ss:$0 sm:$0xff] }
 0x653   :  { %1979 = vmatpush.bf16.msra.mxu0 %v2380_v63 }
 0x654   :  { %v1579_v14 = vpop.f32.mrf.mxu2 }
 0x655   :  { %v1580_v15 = vadd.f32 %v1579_v14, %v1557_v61  ;;  %v1519_v6 = vpop.f32.mrf.mxu0  ;;  %v1548_v26 = vpop.f32.mrf.mxu1  ;;  %v2395_v61 = vld [vmem:[%s2807_s4 + $0x2] ss:$0 sm:$0xff] }
 0x656   :  { %v2377_v26 = vld [vmem:[#allocation3 + $0x238] sm:$0xff] }
 0x657   :  { %v1591_v17 = vadd.f32 %v1590_v16, %v1580_v15  ;;  %1980 = vmatpush.bf16.msra.mxu0 %v2379_v53 }
 0x659   :  { %v1593_v19 = vmul.f32 %v1592_v5, %v1591_v17  ;;  %v2376_v5 = vld [vmem:[#allocation3 + $0x230] sm:$0xff]  ;;  %v2375_v17 = vld [vmem:[#allocation3 + $0x228] sm:$0xff] }
 0x65b   :  { %v1595_v20 = vadd.f32 %v1594_v18, %v1593_v19  ;;  %1981 = vmatpush.bf16.msra.mxu0 %v2378_v21  ;;  %v2396_v18 = vld [vmem:[%s2807_s4 + $0x3] ss:$0 sm:$0xff]  ;;  %v2397_v19 = vld [vmem:[%s2807_s4 + $0x4] ss:$0 sm:$0xff] }
 0x65c   :  { %v1581_v22 = vpop.f32.mrf.mxu2 }
 0x65d   :  { %v1596_v23 = vmul.f32 0.2, %v1595_v20 }
 0x65f   :  { %v1597_v56 = vmax.f32 %v1595_v20, %v1596_v23  ;;  %1982 = vmatpush.bf16.msra.mxu0 %v2377_v26  ;;  %v2398_v23 = vld [vmem:[%s2807_s4 + $0x5] ss:$0 sm:$0xff] }
 0x661   :  { %v1598_v25 = vpack.c.bf16 %v1597_v56, %v1597_v56 }
 0x663   :  { %2203 = vmatmul.msk.bf16.vlgmr.msrb.gmra.mxu3 %vm54_vm10, %v1598_v25  ;;  %2220 = vmatmul.msk.bf16.vlgmr.msrb.gmra.mxu0 %vm54_vm10, %v1598_v25 }
 0x664   :  { %2237 = vmatmul.msk.bf16.vlgmr.msrb.gmra.mxu1 %vm54_vm10, %v1598_v25  ;;  %1983 = vmatpush.bf16.msra.mxu0 %v2376_v5 }
 0x668   :  { %1984 = vmatpush.bf16.msra.mxu0 %v2375_v17 }
 0x6e0   :  { %v1696_v31 = vpop.f32.mrf.mxu0 }
 0x6e1   :  { %v1740_v30 = vpop.f32.mrf.mxu1  ;;  %v1745_v32 = vrot.slane %v1696_v31, 1  ;;  %v1747_v33 = vrot.slane %v1696_v31, 5  ;;  %v2399_v31 = vld [vmem:[%s2807_s4 + $0x6] ss:$0 sm:$0xff] }
 0x6e3   :  { %v1749_v38 = vsel %vm143_vm0, %v1745_v32, %v1747_v33 }
 0x6e4   :  { %v1750_v1 = vmul.f32 %v1749_v38, %v1583_v8 }
 0x6e6   :  { %v1651_v34 = vpop.f32.mrf.mxu3 }
 0x6e7   :  { %v1701_v2 = vrot.slane %v1651_v34, 3  ;;  %v1703_v36 = vrot.slane %v1651_v34, 7 }
 0x6e8   :  { %v1698_v37 = vpop.f32.mrf.mxu0 }
 0x6e9   :  { %v1705_v39 = vsel %vm265_vm7, %v1701_v2, %v1703_v36  ;;  %v1742_v40 = vpop.f32.mrf.mxu1 }
 0x6ea   :  { %v1706_v42 = vmul.f32 %v1705_v39, %v1550_v0 }
 0x6ec   :  { %v1741_v41 = vadd.f32 %v1740_v30, %v1706_v42 }
 0x6ee   :  { %v1751_v4 = vadd.f32 %v1750_v1, %v1741_v41  ;;  %v1653_v51 = vpop.f32.mrf.mxu3 }
 0x6f0   :  { %v1753_v46 = vmul.f32 %v1752_v60, %v1751_v4 }
 0x6f2   :  { %v1755_v47 = vadd.f32 %v1754_v45, %v1753_v46 }
 0x6f4   :  { %v1756_v48 = vmul.f32 0.2, %v1755_v47 }
 0x6f6   :  { %v1757_v11 = vmax.f32 %v1755_v47, %v1756_v48 }
 0x6f8   :  { %1759 = vst.msk [vmem:[#allocation2] sm:$0xf] %vm1758_vm11, %v1757_v11 }
 0x6ff   :  { %v1760_v49 = vld [vmem:[#allocation2] ss:$2 sm:$0x3]  ;;  %v1761_v9 = vld [vmem:[#allocation2 + $0x1] ss:$2 sm:$0x3] }
 0x700   :  { %v1762_v12 = vmax.f32 %v1760_v49, %v1761_v9 }
 0x702   :  { %v1763_v50 = vpack.c.bf16 %v1762_v12, %v1762_v12 }
 0x704   :  { %2254 = vmatmul.msk.bf16.vlgmr.msra.gmra.mxu2 %vm54_vm10, %v1763_v50 }
 0x787   :  { %v1810_v0 = vpop.f32.mrf.mxu2 }
 0x788   :  { %v1811_v24 = vadd.f32 %v2393_v7, %v1810_v0 }
 0x78a   :  { %v1816_v8 = vmul.f32 %v2394_v10, %v1811_v24 }
 0x78c   :  { %v1819_v13 = vadd.f32 %v2395_v61, %v1816_v8 }
 0x78e   :  { %v1820_v14 = vmul.f32 0.2, %v1819_v13 }
 0x78f   :  { %v1812_v15 = vpop.f32.mrf.mxu2 }
 0x790   :  { %v1821_v16 = vmax.f32 %v1819_v13, %v1820_v14 }
 0x792   :  { %v1822_v6 = vpack.c.bf16 %v1821_v16, %v1821_v16 }
 0x794   :  { %1897 = vmatmul.bf16.vlgmr.msra.gmra.mxu3 %v1822_v6 }
 0x817   :  { %v1898_v20 = vpop.f32.mrf.mxu3 }
 0x818   :  { %v1899_v22 = vadd.f32 %v2396_v18, %v1898_v20 }
 0x81a   :  { %v1904_v56 = vmul.f32 %v2397_v19, %v1899_v22 }
 0x81c   :  { %v1907_v25 = vadd.f32 %v2398_v23, %v1904_v56 }
 0x81e   :  { %v1908_v57 = vmul.f32 0.2, %v1907_v25 }
 0x81f   :  { %v1900_v28 = vpop.f32.mrf.mxu3 }
 0x820   :  { %v1909_v27 = vmax.f32 %v1907_v25, %v1908_v57 }
 0x822   :  { %v1910_v29 = vpack.c.bf16 %v1909_v27, %v1909_v27 }
 0x824   :  { %1985 = vmatmul.bf16.vlgmr.msra.gmra.mxu0 %v1910_v29 }
 0x8a1   :  { %v1986_v30 = vpop.f32.mrf.mxu0 }
 0x8a2   :  { %v1987_v62 = vadd.f32 %v2399_v31, %v1986_v30 }
 0x8a4   :  { %1991 = vst.msk [vmem:[#allocation8] sm:$0x3] %vm1990_vm12, %v1987_v62 }
 0x8a5   :  { %2002 = dma.vmem_to_hbm [thread:$0]  %s1998_s3, 32, %s2000_s10, [#allocation5]  }
 0x8a9   :  { %v1988_v32 = vpop.f32.mrf.mxu0 }
 0x8aa   :  { %2476 = dma.done.wait [#allocation5], 32  }
 0x8ab   :  { %2477 = vsyncadd [#allocation5], 4294967264 }
 0x8ac   :  { %2007 = vsyncpa [#allocation4], 1 }
 0x8ad   :  { %2008 = vsyncpa [#allocation7], 1 }
 0x8ae   :  { %2009 = vsyncpa [#allocation5], 1 }

</bundles_post_ra>
